<compile_context>
chip_gen: v6e
topology: v6e:2x2x1
jax: 0.10.0
libtpu: 0.0.40
codegen_flags: <defaults>
</compile_context>

<pallas_src>
import jax
import jax.numpy as jnp
from jax.experimental import pallas as pl
from jax.experimental.pallas import tpu as pltpu


INPUT_SIZE = 784
HIDDEN1 = 512
HIDDEN2 = 256
NUM_CLASSES = 10
PADDED_OUT = 128      # fc3 output width padded to one full lane group (lane-dense stores)


def _round_up(n, m):
    return (n + m - 1) // m * m


def _relu_quant_bucket(h):
    """ReLU + Q1.7 quantize + LSB-nibble compensation, reduced to the bucket index.

    Reference chain (PyTorch bit-string helpers), for a = relu(h) >= 0:
        q   = clamp(floor(a * 128), -128, 127)
        q'  = floor(q / 16) * 16 + 8          # keep high nibble, force low nibble to 0b1000
        out = q' / 128
    which is exactly  out = 0.125 * f + 0.0625  with  f = floor(clip(h, 0, 127/128) * 8).
    Only f is computed in-kernel; the *0.125 scale and +0.0625 offset are folded into
    the next layer's weights / bias (see prepare_params), saving ~2 VPU ops/element.
    """
    return jnp.floor(jnp.clip(h, 0.0, 127.0 / 128.0) * 8.0)


def quantized_mlp_kernel(x_ref, w1_ref, b1_ref, w2_ref, b2_ref, w3_ref, b3_ref, out_ref):
    # Activation tile arrives in its HBM dtype (f32 or bf16); cast to bf16 in VMEM.
    x = x_ref[...].astype(jnp.bfloat16)                                   # (TB, 784)

    # fc1 + fused ReLU/quantize bucket (dropout = identity in eval mode).
    h1 = jnp.dot(x, w1_ref[...], preferred_element_type=jnp.float32) + b1_ref[...]
    f1 = _relu_quant_bucket(h1)                                           # f32 ints in {0..7}

    # fc2 (quant scale/offset of layer-1 activations folded into w2/b2) + quantize bucket.
    h2 = jnp.dot(f1.astype(jnp.bfloat16), w2_ref[...],
                 preferred_element_type=jnp.float32) + b2_ref[...]
    f2 = _relu_quant_bucket(h2)

    # fc3 (folded quant of layer-2 activations); 128 padded lanes, no activation.
    out_ref[...] = jnp.dot(f2.astype(jnp.bfloat16), w3_ref[...],
                           preferred_element_type=jnp.float32) + b3_ref[...]


def prepare_params(params):
    """One-time prep: transpose to (in, out), bf16 weights, pad fc3 out to 128 lanes,
    and fold the previous layer's quant scale (0.125) / offset (+0.0625) into fc2/fc3:
        (0.125*f + 0.0625) @ W + b  ==  f @ (0.125*W) + (b + 0.0625 * colsum(W))
    The 0.125 scale is an exact power-of-two rescale of the bf16 weights; the offset
    uses column sums of the *bf16-cast* weights (in f32) to match MXU operands.
    """
    w1, b1, w2, b2, w3, b3 = params

    w1t = w1.T.astype(jnp.bfloat16)                                       # (784, 512)
    b1r = b1.reshape(1, -1).astype(jnp.float32)                           # (1, 512)

    w2_bf = w2.T.astype(jnp.bfloat16)                                     # (512, 256)
    w2t = (w2_bf.astype(jnp.float32) * 0.125).astype(jnp.bfloat16)        # exact pow-2 scale
    b2r = (b2.astype(jnp.float32)
           + 0.0625 * jnp.sum(w2_bf.astype(jnp.float32), axis=0)).reshape(1, -1)

    w3_pad = (jnp.zeros((HIDDEN2, PADDED_OUT), jnp.float32)
              .at[:, :NUM_CLASSES].set(w3.T))
    w3_bf = w3_pad.astype(jnp.bfloat16)                                   # (256, 128)
    w3t = (w3_bf.astype(jnp.float32) * 0.125).astype(jnp.bfloat16)
    b3_pad = (jnp.zeros((1, PADDED_OUT), jnp.float32)
              .at[:, :NUM_CLASSES].set(b3.reshape(1, -1)))
    b3r = b3_pad + 0.0625 * jnp.sum(w3_bf.astype(jnp.float32), axis=0, keepdims=True)

    return (w1t, b1r, w2t, b2r, w3t, b3r)


def quantized_mlp_forward(x, prepped_params, *, tb_max=1024):
    """x: (B, ...) flattened to (B, 784). Returns (B, 10) float32 logits."""
    w1t, b1r, w2t, b2r, w3t, b3r = prepped_params
    B = x.shape[0]
    x2d = x.reshape(B, -1)
    assert x2d.shape[1] == INPUT_SIZE, x2d.shape
    if x2d.dtype != jnp.bfloat16:
        x2d = x2d.astype(jnp.float32)     # no bf16 materialization in HBM; kernel casts

    # Batch tile: multiple of 16 (bf16 sublane packing), up to tb_max.
    b16 = _round_up(B, 16)
    TB = min(tb_max, b16)
    # v7x has 2 TensorCores: for large batches keep >= 2 "parallel" grid steps.
    if b16 >= 512:
        TB = min(TB, _round_up((b16 + 1) // 2, 16))
    B_pad = _round_up(B, TB)
    if B_pad != B:
        x2d = jnp.pad(x2d, ((0, B_pad - B), (0, 0)))
    grid = (B_pad // TB,)

    flops = 2 * B_pad * (INPUT_SIZE * HIDDEN1 + HIDDEN1 * HIDDEN2 + HIDDEN2 * PADDED_OUT)
    bytes_accessed = (x2d.size * x2d.dtype.itemsize
                      + (w1t.size + w2t.size + w3t.size) * 2
                      + (b1r.size + b2r.size + b3r.size) * 4
                      + B_pad * PADDED_OUT * 4)

    out = pl.pallas_call(
        quantized_mlp_kernel,
        out_shape=jax.ShapeDtypeStruct((B_pad, PADDED_OUT), jnp.float32),
        grid=grid,
        in_specs=[
            pl.BlockSpec((TB, INPUT_SIZE), lambda i: (i, 0)),        # activations: pipelined
            pl.BlockSpec((INPUT_SIZE, HIDDEN1), lambda i: (0, 0)),   # weights/biases: resident
            pl.BlockSpec((1, HIDDEN1), lambda i: (0, 0)),
            pl.BlockSpec((HIDDEN1, HIDDEN2), lambda i: (0, 0)),
            pl.BlockSpec((1, HIDDEN2), lambda i: (0, 0)),
            pl.BlockSpec((HIDDEN2, PADDED_OUT), lambda i: (0, 0)),
            pl.BlockSpec((1, PADDED_OUT), lambda i: (0, 0)),
        ],
        out_specs=pl.BlockSpec((TB, PADDED_OUT), lambda i: (i, 0)),
        compiler_params=pltpu.CompilerParams(
            dimension_semantics=("parallel",),
            vmem_limit_bytes=(32 * 1024 * 1024) if TB > 256 else None,
        ),
        cost_estimate=pl.CostEstimate(flops=flops, transcendentals=0,
                                      bytes_accessed=bytes_accessed),
    )(x2d, w1t, b1r, w2t, b2r, w3t, b3r)

    return out[:B, :NUM_CLASSES]


def init_params(key, input_size=INPUT_SIZE, h1=HIDDEN1, h2=HIDDEN2, num_classes=NUM_CLASSES):
    """Deterministic Kaiming-uniform-style init matching nn.Linear (out, in) shapes."""
    ks = jax.random.split(key, 6)

    def linear(kw, kb, fan_in, fan_out):
        bound = 1.0 / jnp.sqrt(fan_in)
        w = jax.random.uniform(kw, (fan_out, fan_in), jnp.float32, -bound, bound)
        b = jax.random.uniform(kb, (fan_out,), jnp.float32, -bound, bound)
        return w, b

    w1, b1 = linear(ks[0], ks[1], input_size, h1)
    w2, b2 = linear(ks[2], ks[3], h1, h2)
    w3, b3 = linear(ks[4], ks[5], h2, num_classes)
    return (w1, b1, w2, b2, w3, b3)


# ----------------------------- references for testing -----------------------------

def _quantize_and_compensate_ref(a):
    """Faithful transcription of the PyTorch bit-string helpers (floor semantics)."""
    q = jnp.clip(jnp.floor(a * 128.0), -128.0, 127.0)
    return (jnp.floor(q / 16.0) * 16.0 + 8.0) / 128.0


def reference_forward(x, params):
    """Faithful pure-JAX reference (un-folded params, full quant chain, bf16 MXU operands)."""
    w1, b1, w2, b2, w3, b3 = params
    xf = x.reshape(x.shape[0], -1).astype(jnp.float32)
    h = jnp.dot(xf.astype(jnp.bfloat16), w1.T.astype(jnp.bfloat16),
                preferred_element_type=jnp.float32) + b1
    h = _quantize_and_compensate_ref(jnp.maximum(h, 0.0))
    h = jnp.dot(h.astype(jnp.bfloat16), w2.T.astype(jnp.bfloat16),
                preferred_element_type=jnp.float32) + b2
    h = _quantize_and_compensate_ref(jnp.maximum(h, 0.0))
    return jnp.dot(h.astype(jnp.bfloat16), w3.T.astype(jnp.bfloat16),
                   preferred_element_type=jnp.float32) + b3


def folded_reference_forward(x, prepped):
    """Pure-JAX reference with the SAME folded parameters / op structure as the kernel."""
    w1t, b1r, w2t, b2r, w3t, b3r = prepped
    xf = x.reshape(x.shape[0], -1).astype(jnp.float32).astype(jnp.bfloat16)
    h1 = jnp.dot(xf, w1t, preferred_element_type=jnp.float32) + b1r
    f1 = _relu_quant_bucket(h1)
    h2 = jnp.dot(f1.astype(jnp.bfloat16), w2t, preferred_element_type=jnp.float32) + b2r
    f2 = _relu_quant_bucket(h2)
    out = jnp.dot(f2.astype(jnp.bfloat16), w3t, preferred_element_type=jnp.float32) + b3r
    return out[:, :NUM_CLASSES]


if __name__ == "__main__":
    key = jax.random.PRNGKey(0)
    k_x, k_p, k_f, k_x2 = jax.random.split(key, 4)

    # MNIST-like small input: (B=2, 1, 28, 28) -> flattened to (2, 784).
    x = jax.random.normal(k_x, (2, 1, 28, 28), dtype=jnp.float32)
    params = init_params(k_p)
    prepped = prepare_params(params)        # one-time transpose / pad / bf16 / quant folding

    out = quantized_mlp_forward(x, prepped)
    out = jax.block_until_ready(out)
    assert out.shape == (2, NUM_CLASSES), out.shape

    # Check 1: fused ReLU+Q1.7+LSB formula == faithful bit-string chain (exact: all ops
    # involved are power-of-two scalings / floors, so f32 results are bitwise equal).
    v = jnp.linspace(-2.0, 2.0, 16001, dtype=jnp.float32)
    fused = _relu_quant_bucket(v) * 0.125 + 0.0625
    faithful_q = _quantize_and_compensate_ref(jnp.maximum(v, 0.0))
    assert bool(jnp.all(fused == faithful_q)), "fused quantization formula mismatch"

    # Check 2: scale/offset folding identity for fc2/fc3 (floor-free, tight tolerance).
    w1, b1, w2, b2, w3, b3 = params
    w1t, b1r, w2t, b2r, w3t, b3r = prepped
    f_test = jnp.floor(jax.random.uniform(k_f, (8, HIDDEN1), jnp.float32) * 8.0)  # buckets 0..7
    q_test = 0.125 * f_test + 0.0625
    lhs2 = jnp.dot(q_test.astype(jnp.bfloat16), w2.T.astype(jnp.bfloat16),
                   preferred_element_type=jnp.float32) + b2
    rhs2 = jnp.dot(f_test.astype(jnp.bfloat16), w2t, preferred_element_type=jnp.float32) + b2r
    assert jnp.allclose(lhs2, rhs2, atol=1e-4, rtol=1e-4), "fc2 quant folding mismatch"
    g_test = f_test[:, :HIDDEN2]
    lhs3 = jnp.dot((0.125 * g_test + 0.0625).astype(jnp.bfloat16), w3.T.astype(jnp.bfloat16),
                   preferred_element_type=jnp.float32) + b3
    rhs3 = (jnp.dot(g_test.astype(jnp.bfloat16), w3t,
                    preferred_element_type=jnp.float32) + b3r)[:, :NUM_CLASSES]
    assert jnp.allclose(lhs3, rhs3, atol=1e-4, rtol=1e-4), "fc3 quant folding mismatch"

    # Check 3: kernel vs folded pure-JAX reference (identical operands -> tight-ish tol).
    ref_folded = folded_reference_forward(x, prepped)
    err_f = float(jnp.max(jnp.abs(out - ref_folded)))
    assert jnp.allclose(out, ref_folded, atol=2e-3, rtol=2e-3), f"kernel vs folded ref: {err_f}"

    # Check 4: kernel vs faithful (un-folded) reference.  Tolerance allows for a rare
    # quantization-bucket flip caused by ~1e-6 f32 summation-order differences.
    ref = reference_forward(x, params)
    err = float(jnp.max(jnp.abs(out - ref)))
    assert err < 3e-2, f"kernel vs faithful reference, max_err={err}"

    # Exercise the batch-padding path (B not a multiple of 16).
    x33 = jax.random.normal(k_x2, (33, 1, 28, 28), dtype=jnp.float32)
    out33 = jax.block_until_ready(quantized_mlp_forward(x33, prepped))
    assert out33.shape == (33, NUM_CLASSES), out33.shape
    ref33 = folded_reference_forward(x33, prepped)
    assert jnp.allclose(out33, ref33, atol=2e-3, rtol=2e-3), "batch-padded run mismatch"

    print("KERNEL_OK")
</pallas_src>

<mosaic_0001>
module attributes {stable_mosaic.version = 11 : i64} {
  func.func @quantized_mlp_kernel(%arg0: i32, %arg1: memref<16x784xf32, #tpu.memory_space<vmem>>, %arg2: memref<784x512xbf16, #tpu.memory_space<vmem>>, %arg3: memref<1x512xf32, #tpu.memory_space<vmem>>, %arg4: memref<512x256xbf16, #tpu.memory_space<vmem>>, %arg5: memref<1x256xf32, #tpu.memory_space<vmem>>, %arg6: memref<256x128xbf16, #tpu.memory_space<vmem>>, %arg7: memref<1x128xf32, #tpu.memory_space<vmem>>, %arg8: memref<16x128xf32, #tpu.memory_space<vmem>>) attributes {dimension_semantics = [#tpu.dimension_semantics<parallel>], iteration_bounds = array<i64: 1>, scalar_prefetch = 0 : i64, scratch_operands = 0 : i64, tpu.core_type = #tpu.core_type<tc>, window_params = [{transform_indices = @transform_0, window_bounds = array<i64: 16, 784>}, {pipeline_mode = #tpu.pipeline_mode<synchronous>, transform_indices = @transform_1, window_bounds = array<i64: 784, 512>}, {pipeline_mode = #tpu.pipeline_mode<synchronous>, transform_indices = @transform_2, window_bounds = array<i64: 1, 512>}, {pipeline_mode = #tpu.pipeline_mode<synchronous>, transform_indices = @transform_3, window_bounds = array<i64: 512, 256>}, {pipeline_mode = #tpu.pipeline_mode<synchronous>, transform_indices = @transform_4, window_bounds = array<i64: 1, 256>}, {pipeline_mode = #tpu.pipeline_mode<synchronous>, transform_indices = @transform_5, window_bounds = array<i64: 256, 128>}, {pipeline_mode = #tpu.pipeline_mode<synchronous>, transform_indices = @transform_6, window_bounds = array<i64: 1, 128>}, {transform_indices = @transform_7, window_bounds = array<i64: 16, 128>}]} {
    %c0 = arith.constant 0 : index
    %c0_0 = arith.constant 0 : index
    %0 = vector.load %arg1[%c0, %c0_0] : memref<16x784xf32, #tpu.memory_space<vmem>>, vector<16x784xf32>
    %1 = arith.truncf %0 : vector<16x784xf32> to vector<16x784xbf16>
    %c0_1 = arith.constant 0 : index
    %c0_2 = arith.constant 0 : index
    %2 = vector.load %arg2[%c0_1, %c0_2] : memref<784x512xbf16, #tpu.memory_space<vmem>>, vector<784x512xbf16>
    %cst = arith.constant dense<0.000000e+00> : vector<16x512xf32>
    %3 = tpu.matmul %1, %2, %cst {dimension_numbers = #tpu.dot_dimension_numbers<[1], [0], [0], [1], [0, 0, 1, 1], [], []>} : vector<16x784xbf16>, vector<784x512xbf16>, vector<16x512xf32> -> vector<16x512xf32>
    %c0_3 = arith.constant 0 : index
    %c0_4 = arith.constant 0 : index
    %4 = vector.load %arg3[%c0_3, %c0_4] : memref<1x512xf32, #tpu.memory_space<vmem>>, vector<1x512xf32>
    %5 = vector.broadcast %4 : vector<1x512xf32> to vector<16x512xf32>
    %6 = arith.addf %3, %5 : vector<16x512xf32>
    %cst_5 = arith.constant 0.000000e+00 : f32
    %cst_6 = arith.constant 0.9921875 : f32
    %7 = vector.broadcast %cst_5 : f32 to vector<16x512xf32>
    %8 = arith.maximumf %7, %6 : vector<16x512xf32>
    %9 = vector.broadcast %cst_6 : f32 to vector<16x512xf32>
    %10 = arith.minimumf %9, %8 : vector<16x512xf32>
    %cst_7 = arith.constant 8.000000e+00 : f32
    %11 = vector.broadcast %cst_7 : f32 to vector<16x512xf32>
    %12 = arith.mulf %10, %11 : vector<16x512xf32>
    %13 = math.floor %12 : vector<16x512xf32>
    %14 = arith.truncf %13 : vector<16x512xf32> to vector<16x512xbf16>
    %c0_8 = arith.constant 0 : index
    %c0_9 = arith.constant 0 : index
    %15 = vector.load %arg4[%c0_8, %c0_9] : memref<512x256xbf16, #tpu.memory_space<vmem>>, vector<512x256xbf16>
    %cst_10 = arith.constant dense<0.000000e+00> : vector<16x256xf32>
    %16 = tpu.matmul %14, %15, %cst_10 {dimension_numbers = #tpu.dot_dimension_numbers<[1], [0], [0], [1], [0, 0, 1, 1], [], []>} : vector<16x512xbf16>, vector<512x256xbf16>, vector<16x256xf32> -> vector<16x256xf32>
    %c0_11 = arith.constant 0 : index
    %c0_12 = arith.constant 0 : index
    %17 = vector.load %arg5[%c0_11, %c0_12] : memref<1x256xf32, #tpu.memory_space<vmem>>, vector<1x256xf32>
    %18 = vector.broadcast %17 : vector<1x256xf32> to vector<16x256xf32>
    %19 = arith.addf %16, %18 : vector<16x256xf32>
    %cst_13 = arith.constant 0.000000e+00 : f32
    %cst_14 = arith.constant 0.9921875 : f32
    %20 = vector.broadcast %cst_13 : f32 to vector<16x256xf32>
    %21 = arith.maximumf %20, %19 : vector<16x256xf32>
    %22 = vector.broadcast %cst_14 : f32 to vector<16x256xf32>
    %23 = arith.minimumf %22, %21 : vector<16x256xf32>
    %cst_15 = arith.constant 8.000000e+00 : f32
    %24 = vector.broadcast %cst_15 : f32 to vector<16x256xf32>
    %25 = arith.mulf %23, %24 : vector<16x256xf32>
    %26 = math.floor %25 : vector<16x256xf32>
    %27 = arith.truncf %26 : vector<16x256xf32> to vector<16x256xbf16>
    %c0_16 = arith.constant 0 : index
    %c0_17 = arith.constant 0 : index
    %28 = vector.load %arg6[%c0_16, %c0_17] : memref<256x128xbf16, #tpu.memory_space<vmem>>, vector<256x128xbf16>
    %cst_18 = arith.constant dense<0.000000e+00> : vector<16x128xf32>
    %29 = tpu.matmul %27, %28, %cst_18 {dimension_numbers = #tpu.dot_dimension_numbers<[1], [0], [0], [1], [0, 0, 1, 1], [], []>} : vector<16x256xbf16>, vector<256x128xbf16>, vector<16x128xf32> -> vector<16x128xf32>
    %c0_19 = arith.constant 0 : index
    %c0_20 = arith.constant 0 : index
    %30 = vector.load %arg7[%c0_19, %c0_20] : memref<1x128xf32, #tpu.memory_space<vmem>>, vector<1x128xf32>
    %31 = vector.broadcast %30 : vector<1x128xf32> to vector<16x128xf32>
    %32 = arith.addf %29, %31 : vector<16x128xf32>
    %c0_21 = arith.constant 0 : index
    %c0_22 = arith.constant 0 : index
    %33 = vector.load %arg8[%c0_21, %c0_22] : memref<16x128xf32, #tpu.memory_space<vmem>>, vector<16x128xf32>
    tpu.vector_store %arg8[%c0_21, %c0_22], %32 {strides = array<i32>} : memref<16x128xf32, #tpu.memory_space<vmem>>, vector<16x128xf32>,
    return
  }
  func.func @transform_0(%arg0: i32) -> (i32, i32) {
    %c0_i32 = arith.constant 0 : i32
    %c0_i32_0 = arith.constant 0 : i32
    return %arg0, %c0_i32 : i32, i32
  }
  func.func @transform_1(%arg0: i32) -> (i32, i32) {
    %c0_i32 = arith.constant 0 : i32
    %c0_i32_0 = arith.constant 0 : i32
    %c0_i32_1 = arith.constant 0 : i32
    return %c0_i32, %c0_i32_0 : i32, i32
  }
  func.func @transform_2(%arg0: i32) -> (i32, i32) {
    %c0_i32 = arith.constant 0 : i32
    %c0_i32_0 = arith.constant 0 : i32
    %c0_i32_1 = arith.constant 0 : i32
    return %c0_i32, %c0_i32_0 : i32, i32
  }
  func.func @transform_3(%arg0: i32) -> (i32, i32) {
    %c0_i32 = arith.constant 0 : i32
    %c0_i32_0 = arith.constant 0 : i32
    %c0_i32_1 = arith.constant 0 : i32
    return %c0_i32, %c0_i32_0 : i32, i32
  }
  func.func @transform_4(%arg0: i32) -> (i32, i32) {
    %c0_i32 = arith.constant 0 : i32
    %c0_i32_0 = arith.constant 0 : i32
    %c0_i32_1 = arith.constant 0 : i32
    return %c0_i32, %c0_i32_0 : i32, i32
  }
  func.func @transform_5(%arg0: i32) -> (i32, i32) {
    %c0_i32 = arith.constant 0 : i32
    %c0_i32_0 = arith.constant 0 : i32
    %c0_i32_1 = arith.constant 0 : i32
    return %c0_i32, %c0_i32_0 : i32, i32
  }
  func.func @transform_6(%arg0: i32) -> (i32, i32) {
    %c0_i32 = arith.constant 0 : i32
    %c0_i32_0 = arith.constant 0 : i32
    %c0_i32_1 = arith.constant 0 : i32
    return %c0_i32, %c0_i32_0 : i32, i32
  }
  func.func @transform_7(%arg0: i32) -> (i32, i32) {
    %c0_i32 = arith.constant 0 : i32
    %c0_i32_0 = arith.constant 0 : i32
    return %arg0, %c0_i32 : i32, i32
  }
}

</mosaic_0001>

<bundles_post_ra>
// kernel: tpu_custom_call.1
= control target key start
LH: loop header
LB: loop body
LE: loop exit
PB: predicated region body
PF: predicated region fallthrough
CT: control target
= control target key end

     0   :  { %12 = vsyncpa [#allocation3], 0  ;;  %s3381_s0 = inlined_call_operand.hbm [shape: f32[16,784], index: 0, kind: input, shape index: {}]   ;;  %s3382_s1 = inlined_call_operand.hbm [shape: bf16[784,512], index: 1, kind: input, shape index: {}]   ;;  %s3383_s2 = inlined_call_operand.hbm [shape: f32[1,512], index: 2, kind: input, shape index: {}]   ;;  %s3384_s3 = inlined_call_operand.hbm [shape: bf16[512,256], index: 3, kind: input, shape index: {}]   ;;  %s3385_s4 = inlined_call_operand.vmem [shape: f32[1,256], index: 4, kind: input, shape index: {}]   ;;  %s3386_s5 = inlined_call_operand.hbm [shape: bf16[256,128], index: 5, kind: input, shape index: {}]   ;;  %s3387_s6 = inlined_call_operand.vmem [shape: f32[1,128], index: 6, kind: input, shape index: {}]   ;;  %s3388_s7 = inlined_call_operand.hbm [shape: f32[16,128], index: 7, kind: output, shape index: {}]  }
   0x1   :  { %13 = vsyncpa [#allocation6], 0 }
   0x2   :  { %14 = vsyncpa [#allocation9], 0 }
   0x3   :  { %15 = vsyncpa [#allocation4], 0  ;;  %s3244_s24 = smov [#allocation5]  }
   0x4   :  { %s33_s25 = sshll.u32 %s3244_s24, 4  ;;  %s34_s25 = int_to_ptr.vmem [resolvable:$true] %s33_s25 }
   0x5   :  { %s3124_s26 = scalar_lea.vmem %s34_s25, 25088  ;;  %p3129_p1 = scmp.lt.s32.totalorder %s34_s25, %s34_s25 }
   0x6   :  { %p3125_p0 = scmp.ne.s32.totalorder %s34_s25, %s3124_s26  ;;  %p3130_p2 = scmp.lt.s32.totalorder %s3124_s26, %s3124_s26 }
   0x8   :  { %p3131_p3 = por %p3130_p2, %p3129_p1 }
   0xa   :  { %p3132_p4 = pnand %p3131_p3, %p3125_p0 }
   0xc   :  { %3135 = shalt.err (!%p3132_p4)
}
   0xd   :  { %s3245_s27 = smov 256   ;;  %s3246_s28 = smov 16  }
   0xe   :  { %39 = dma.hbm_to_vmem [thread:$0]  %s3382_s1, 25088, %s34_s25, [#allocation6], %s3245_s27, %s3245_s27, %s3246_s28  }
   0xf   :  { %s3247_s8 = smov [#allocation8]  }
  0x10   :  { %s55_s9 = sshll.u32 %s3247_s8, 4  ;;  %s56_s9 = int_to_ptr.vmem [resolvable:$true] %s55_s9 }
  0x11   :  { %s3144_s10 = scalar_lea.vmem %s56_s9, 8192  ;;  %p3149_p6 = scmp.lt.s32.totalorder %s56_s9, %s56_s9 }
  0x12   :  { %p3145_p5 = scmp.ne.s32.totalorder %s56_s9, %s3144_s10  ;;  %p3150_p7 = scmp.lt.s32.totalorder %s3144_s10, %s3144_s10 }
  0x14   :  { %p3151_p8 = por %p3150_p7, %p3149_p6 }
  0x16   :  { %p3152_p9 = pnand %p3151_p8, %p3145_p5 }
  0x18   :  { %3155 = shalt.err (!%p3152_p9)
}
  0x19   :  { %s3248_s11 = smov 128   ;;  %s3249_s12 = smov 8  }
  0x1a   :  { %61 = dma.hbm_to_vmem [thread:$0]  %s3384_s3, 8192, %s56_s9, [#allocation9], %s3248_s11, %s3248_s11, %s3249_s12  }
  0x1b   :  { %s3250_s1 = smov [#allocation2]  }
  0x1c   :  { %s21_s15 = sshll.u32 %s3250_s1, 4  ;;  %s22_s15 = int_to_ptr.vmem [resolvable:$true] %s21_s15 }
  0x1d   :  { %s3164_s16 = scalar_lea.vmem %s22_s15, 1792  ;;  %p3169_p11 = scmp.lt.s32.totalorder %s22_s15, %s22_s15 }
  0x1e   :  { %p3165_p10 = scmp.ne.s32.totalorder %s22_s15, %s3164_s16  ;;  %p3170_p12 = scmp.lt.s32.totalorder %s3164_s16, %s3164_s16 }
  0x20   :  { %p3171_p13 = por %p3170_p12, %p3169_p11 }
  0x22   :  { %p3172_p0 = pnand %p3171_p13, %p3165_p10 }
  0x24   :  { %3175 = shalt.err (!%p3172_p0)
}
  0x25   :  { %s3251_s17 = smov 896   ;;  %s3252_s18 = smov 56  }
  0x26   :  { %27 = dma.hbm_to_vmem [thread:$0]  %s3381_s0, 1792, %s22_s15, [#allocation3], %s3251_s17, %s3251_s17, %s3252_s18  }
  0x27   :  { %s3253_s21 = smov [#allocation7]   ;;  %s3254_s3 = smov [#allocation10]  }
  0x28   :  { %s46_s22 = sshll.u32 %s3253_s21, 4  ;;  %s69_s23 = sshll.u32 %s3254_s3, 4  ;;  %s47_s22 = int_to_ptr.vmem [resolvable:$true] %s46_s22  ;;  %s70_s23 = int_to_ptr.vmem [resolvable:$true] %s69_s23 }
  0x29   :  { %s3184_s24 = scalar_lea.vmem %s47_s22, 64  ;;  %p3189_p2 = scmp.lt.s32.totalorder %s47_s22, %s47_s22 }
  0x2a   :  { %p3185_p1 = scmp.ne.s32.totalorder %s47_s22, %s3184_s24  ;;  %p3190_p3 = scmp.lt.s32.totalorder %s3184_s24, %s3184_s24 }
  0x2c   :  { %p3191_p4 = por %p3190_p3, %p3189_p2 }
  0x2e   :  { %p3192_p5 = pnand %p3191_p4, %p3185_p1 }
  0x30   :  { %3195 = shalt.err (!%p3192_p5)
}
  0x31   :  { %49 = dma.hbm_to_vmem [thread:$0]  %s3383_s2, 64, %s47_s22, [#allocation6]  }
  0x32   :  { %s3204_s27 = scalar_lea.vmem %s70_s23, 2048  ;;  %p3209_p7 = scmp.lt.s32.totalorder %s70_s23, %s70_s23 }
  0x33   :  { %p3205_p6 = scmp.ne.s32.totalorder %s70_s23, %s3204_s27  ;;  %p3210_p8 = scmp.lt.s32.totalorder %s3204_s27, %s3204_s27 }
  0x35   :  { %p3211_p9 = por %p3210_p8, %p3209_p7 }
  0x37   :  { %p3212_p10 = pnand %p3211_p9, %p3205_p6 }
  0x39   :  { %3215 = shalt.err (!%p3212_p10)
}
  0x3a   :  { %s3255_s0 = smov 64   ;;  %s3256_s28 = smov 4  }
  0x3b   :  { %75 = dma.hbm_to_vmem [thread:$0]  %s3386_s5, 2048, %s70_s23, [#allocation9], %s3255_s0, %s3255_s0, %s3256_s28  }
  0x3c   :  { %3236 = dma.done.wait [#allocation3], 1792  }
  0x3d   :  { %3237 = vsyncadd [#allocation3], 4294965504 }
  0x3e   :  { %3238 = dma.done.wait [#allocation6], 25152  }
  0x3f   :  { %3239 = vsyncadd [#allocation6], 4294942144 }
  0x40   :  { %3240 = dma.done.wait [#allocation9], 10240  }
  0x41   :  { %3241 = vsyncadd [#allocation9], 4294957056  ;;  %v2710_v0 = vld [vmem:[#allocation5 + $0xe4] ss:$16 sps:$4 sm:$0xff]   ;;  %v2714_v2 = vld [vmem:[#allocation5 + $0xe0] ss:$16 sps:$4 sm:$0xff]  }
  0x42   :  { %v2712_v1 = vld [vmem:[#allocation5 + $0x2e4] ss:$16 sps:$4 sm:$0xff]   ;;  %1317 = vmatprep.subr.bf16.mxu0 %v2710_v0  ;;  %v2715_v3 = vld [vmem:[#allocation5 + $0x2e0] ss:$16 sps:$4 sm:$0xff]   ;;  %v95_v46 = vld [vmem:[#allocation2 + $0x8] sm:$0xff]  ;;  %vm1313_vm0 = vcmask 130048  }
  0x43   :  { %1360 = vmatprep.subr.bf16.mxu1 %v2712_v1  ;;  %v2716_v4 = vld [vmem:[#allocation5 + $0xc4] ss:$16 sps:$4 sm:$0xff]   ;;  %1318 = vmatpush1.bf16.msra.mxu0 %v2714_v2  ;;  %v2720_v6 = vld [vmem:[#allocation5 + $0xc0] ss:$16 sps:$4 sm:$0xff]   ;;  %v97_v48 = vld [vmem:[#allocation2 + $0x18] sm:$0xff]  ;;  %s3258_s9 = smov [#allocation11]  }
  0x44   :  { %1361 = vmatpush1.bf16.msra.mxu1 %v2715_v3  ;;  %v2718_v5 = vld [vmem:[#allocation5 + $0x2c4] ss:$16 sps:$4 sm:$0xff]   ;;  %1319 = vmatprep.subr.bf16.mxu0 %v2716_v4  ;;  %v2721_v7 = vld [vmem:[#allocation5 + $0x2c0] ss:$16 sps:$4 sm:$0xff]   ;;  %s2380_s10 = sshll.u32 %s3258_s9, 4  ;;  %s2381_s10 = int_to_ptr.vmem [resolvable:$true] %s2380_s10 }
  0x45   :  { %1362 = vmatprep.subr.bf16.mxu1 %v2718_v5  ;;  %v2722_v8 = vld [vmem:[#allocation5 + $0xa4] ss:$16 sps:$4 sm:$0xff]   ;;  %v2726_v10 = vld [vmem:[#allocation5 + $0xa0] ss:$16 sps:$4 sm:$0xff]   ;;  %s3216_s13 = scalar_lea.vmem %s2381_s10, 256  ;;  %p3221_p12 = scmp.lt.s32.totalorder %s2381_s10, %s2381_s10 }
  0x46   :  { %v2724_v9 = vld [vmem:[#allocation5 + $0x2a4] ss:$16 sps:$4 sm:$0xff]   ;;  %v2727_v11 = vld [vmem:[#allocation5 + $0x2a0] ss:$16 sps:$4 sm:$0xff]   ;;  %p3217_p11 = scmp.ne.s32.totalorder %s2381_s10, %s3216_s13  ;;  %p3222_p13 = scmp.lt.s32.totalorder %s3216_s13, %s3216_s13 }
  0x47   :  { %1320 = vmatpush1.bf16.msra.mxu0 %v2720_v6  ;;  %v2728_v12 = vld [vmem:[#allocation5 + $0x84] ss:$16 sps:$4 sm:$0xff]   ;;  %v2732_v14 = vld [vmem:[#allocation5 + $0x80] ss:$16 sps:$4 sm:$0xff]  }
  0x48   :  { %1363 = vmatpush1.bf16.msra.mxu1 %v2721_v7  ;;  %1321 = vmatprep.subr.bf16.mxu0 %v2722_v8  ;;  %v2730_v13 = vld [vmem:[#allocation5 + $0x284] ss:$16 sps:$4 sm:$0xff]   ;;  %v2733_v15 = vld [vmem:[#allocation5 + $0x280] ss:$16 sps:$4 sm:$0xff]   ;;  %v101_v7 = vld [vmem:[#allocation2 + $0x38] sm:$0xff]  ;;  %p3223_p0 = por %p3222_p13, %p3221_p12 }
  0x49   :  { %1364 = vmatprep.subr.bf16.mxu1 %v2724_v9  ;;  %v2734_v16 = vld [vmem:[#allocation5 + $0x64] ss:$16 sps:$4 sm:$0xff]   ;;  %v2738_v18 = vld [vmem:[#allocation5 + $0x60] ss:$16 sps:$4 sm:$0xff]   ;;  %v103_v9 = vld [vmem:[#allocation2 + $0x48] sm:$0xff] }
  0x4a   :  { %v2736_v17 = vld [vmem:[#allocation5 + $0x264] ss:$16 sps:$4 sm:$0xff]   ;;  %v2739_v19 = vld [vmem:[#allocation5 + $0x260] ss:$16 sps:$4 sm:$0xff]   ;;  %p3224_p1 = pnand %p3223_p0, %p3217_p11 }
  0x4b   :  { %1322 = vmatpush1.bf16.msra.mxu0 %v2726_v10  ;;  %v2740_v20 = vld [vmem:[#allocation5 + $0x44] ss:$16 sps:$4 sm:$0xff]   ;;  %v2744_v22 = vld [vmem:[#allocation5 + $0x40] ss:$16 sps:$4 sm:$0xff]  }
  0x4c   :  { %1365 = vmatpush1.bf16.msra.mxu1 %v2727_v11  ;;  %1323 = vmatprep.subr.bf16.mxu0 %v2728_v12  ;;  %v2742_v21 = vld [vmem:[#allocation5 + $0x244] ss:$16 sps:$4 sm:$0xff]   ;;  %v2745_v23 = vld [vmem:[#allocation5 + $0x240] ss:$16 sps:$4 sm:$0xff]  }
  0x4d   :  { %1366 = vmatprep.subr.bf16.mxu1 %v2730_v13  ;;  %v2746_v24 = vld [vmem:[#allocation5 + $0x24] ss:$16 sps:$4 sm:$0xff]   ;;  %v2750_v26 = vld [vmem:[#allocation5 + $0x20] ss:$16 sps:$4 sm:$0xff]  }
  0x4e   :  { %v2748_v25 = vld [vmem:[#allocation5 + $0x224] ss:$16 sps:$4 sm:$0xff]   ;;  %v2751_v27 = vld [vmem:[#allocation5 + $0x220] ss:$16 sps:$4 sm:$0xff]  }
  0x4f   :  { %1324 = vmatpush1.bf16.msra.mxu0 %v2732_v14  ;;  %v2752_v28 = vld [vmem:[#allocation5 + $0x4] ss:$16 sps:$4 sm:$0xff]   ;;  %v2756_v30 = vld [vmem:[#allocation5] ss:$16 sps:$4 sm:$0xff]  }
  0x50   :  { %1367 = vmatpush1.bf16.msra.mxu1 %v2733_v15  ;;  %1325 = vmatprep.subr.bf16.mxu0 %v2734_v16  ;;  %v2754_v29 = vld [vmem:[#allocation5 + $0x204] ss:$16 sps:$4 sm:$0xff]   ;;  %v2757_v31 = vld [vmem:[#allocation5 + $0x200] ss:$16 sps:$4 sm:$0xff]  }
  0x51   :  { %1368 = vmatprep.subr.bf16.mxu1 %v2736_v17  ;;  %v2758_v32 = vld [vmem:[#allocation5 + $0x1e4] ss:$16 sps:$4 sm:$0xff]   ;;  %v2762_v34 = vld [vmem:[#allocation5 + $0x1e0] ss:$16 sps:$4 sm:$0xff]   ;;  %v2817_v17 = vld [vmem:[#allocation5 + $0xec] ss:$16 sps:$4 sm:$0xff]  }
  0x52   :  { %v2760_v33 = vld [vmem:[#allocation5 + $0x3e4] ss:$16 sps:$4 sm:$0xff]   ;;  %v2763_v35 = vld [vmem:[#allocation5 + $0x3e0] ss:$16 sps:$4 sm:$0xff]  }
  0x53   :  { %1326 = vmatpush1.bf16.msra.mxu0 %v2738_v18  ;;  %v2764_v36 = vld [vmem:[#allocation5 + $0x1c4] ss:$16 sps:$4 sm:$0xff]   ;;  %v2768_v38 = vld [vmem:[#allocation5 + $0x1c0] ss:$16 sps:$4 sm:$0xff]  }
  0x54   :  { %1369 = vmatpush1.bf16.msra.mxu1 %v2739_v19  ;;  %1327 = vmatprep.subr.bf16.mxu0 %v2740_v20  ;;  %v2766_v37 = vld [vmem:[#allocation5 + $0x3c4] ss:$16 sps:$4 sm:$0xff]   ;;  %v2769_v39 = vld [vmem:[#allocation5 + $0x3c0] ss:$16 sps:$4 sm:$0xff]   ;;  %v107_v20 = vld [vmem:[#allocation2 + $0x68] sm:$0xff] }
  0x55   :  { %1370 = vmatprep.subr.bf16.mxu1 %v2742_v21  ;;  %v2770_v40 = vld [vmem:[#allocation5 + $0x1a4] ss:$16 sps:$4 sm:$0xff]   ;;  %v2774_v42 = vld [vmem:[#allocation5 + $0x1a0] ss:$16 sps:$4 sm:$0xff]   ;;  %v3257_v21 = vmov 0  }
  0x56   :  { %v2772_v41 = vld [vmem:[#allocation5 + $0x3a4] ss:$16 sps:$4 sm:$0xff]   ;;  %v2775_v43 = vld [vmem:[#allocation5 + $0x3a0] ss:$16 sps:$4 sm:$0xff]  }
  0x57   :  { %1328 = vmatpush1.bf16.msra.mxu0 %v2744_v22  ;;  %v2776_v44 = vld [vmem:[#allocation5 + $0x184] ss:$16 sps:$4 sm:$0xff]   ;;  %v2780_v50 = vld [vmem:[#allocation5 + $0x180] ss:$16 sps:$4 sm:$0xff]  }
  0x58   :  { %1371 = vmatpush1.bf16.msra.mxu1 %v2745_v23  ;;  %1329 = vmatprep.subr.bf16.mxu0 %v2746_v24  ;;  %v2778_v45 = vld [vmem:[#allocation5 + $0x384] ss:$16 sps:$4 sm:$0xff]   ;;  %v2781_v51 = vld [vmem:[#allocation5 + $0x380] ss:$16 sps:$4 sm:$0xff]   ;;  %v2815_v24 = vld [vmem:[#allocation5 + $0xe8] ss:$16 sps:$4 sm:$0xff]  }
  0x59   :  { %1372 = vmatprep.subr.bf16.mxu1 %v2748_v25  ;;  %v102_v47 = vld [vmem:[#allocation2 + $0x40] sm:$0xff]  ;;  %v104_v49 = vld [vmem:[#allocation2 + $0x50] sm:$0xff] }
  0x5a   :  { %v2782_v52 = vld [vmem:[#allocation5 + $0x164] ss:$16 sps:$4 sm:$0xff]   ;;  %v3317_v53 = vpack.c.bf16 %v102_v47, %v95_v46  ;;  %v3319_v54 = vpack.c.bf16 %v104_v49, %v97_v48  ;;  %v2786_v56 = vld [vmem:[#allocation5 + $0x160] ss:$16 sps:$4 sm:$0xff]   ;;  %v2845_v47 = vld [vmem:[#allocation5 + $0x48] ss:$16 sps:$4 sm:$0xff]  }
  0x5b   :  { %1330 = vmatpush1.bf16.msra.mxu0 %v2750_v26  ;;  %v2784_v55 = vld [vmem:[#allocation5 + $0x364] ss:$16 sps:$4 sm:$0xff]   ;;  %v2787_v57 = vld [vmem:[#allocation5 + $0x360] ss:$16 sps:$4 sm:$0xff]   ;;  %v2823_v26 = vld [vmem:[#allocation5 + $0xcc] ss:$16 sps:$4 sm:$0xff]  }
  0x5c   :  { %1373 = vmatpush1.bf16.msra.mxu1 %v2751_v27  ;;  %1331 = vmatprep.subr.bf16.mxu0 %v2752_v28  ;;  %v2788_v58 = vld [vmem:[#allocation5 + $0x144] ss:$16 sps:$4 sm:$0xff]   ;;  %v2792_v60 = vld [vmem:[#allocation5 + $0x140] ss:$16 sps:$4 sm:$0xff]   ;;  %v2821_v28 = vld [vmem:[#allocation5 + $0xc8] ss:$16 sps:$4 sm:$0xff]  }
  0x5d   :  { %1374 = vmatprep.subr.bf16.mxu1 %v2754_v29  ;;  %1349 = vmatprep.mubr.bf16.mxu0 %v3317_v53  ;;  %v2790_v59 = vld [vmem:[#allocation5 + $0x344] ss:$16 sps:$4 sm:$0xff]   ;;  %v2793_v61 = vld [vmem:[#allocation5 + $0x340] ss:$16 sps:$4 sm:$0xff]   ;;  %v2853_v49 = vld [vmem:[#allocation5 + $0x2c] ss:$16 sps:$4 sm:$0xff]  }
  0x5e   :  { %1392 = vmatprep.mubr.bf16.mxu1 %v3319_v54  ;;  %v2794_v62 = vld [vmem:[#allocation5 + $0x124] ss:$16 sps:$4 sm:$0xff]   ;;  %v2798_v0 = vld [vmem:[#allocation5 + $0x120] ss:$16 sps:$4 sm:$0xff]  }
  0x5f   :  { %1332 = vmatpush1.bf16.msra.mxu0 %v2756_v30  ;;  %v2796_v63 = vld [vmem:[#allocation5 + $0x324] ss:$16 sps:$4 sm:$0xff]   ;;  %v2799_v1 = vld [vmem:[#allocation5 + $0x320] ss:$16 sps:$4 sm:$0xff]   ;;  %v2829_v30 = vld [vmem:[#allocation5 + $0xac] ss:$16 sps:$4 sm:$0xff]  }
  0x60   :  { %1375 = vmatpush1.bf16.msra.mxu1 %v2757_v31  ;;  %1333 = vmatprep.subr.bf16.mxu0 %v2758_v32  ;;  %v2800_v2 = vld [vmem:[#allocation5 + $0x104] ss:$16 sps:$4 sm:$0xff]   ;;  %v2804_v4 = vld [vmem:[#allocation5 + $0x100] ss:$16 sps:$4 sm:$0xff]   ;;  %v2827_v32 = vld [vmem:[#allocation5 + $0xa8] ss:$16 sps:$4 sm:$0xff]  }
  0x61   :  { %1376 = vmatprep.subr.bf16.mxu1 %v2760_v33  ;;  %v2802_v3 = vld [vmem:[#allocation5 + $0x304] ss:$16 sps:$4 sm:$0xff]   ;;  %v2805_v5 = vld [vmem:[#allocation5 + $0x300] ss:$16 sps:$4 sm:$0xff]  }
  0x62   :  { %v94_v6 = vld [vmem:[#allocation2] sm:$0xff]  ;;  %v96_v8 = vld [vmem:[#allocation2 + $0x10] sm:$0xff] }
  0x63   :  { %1334 = vmatpush2.bf16.msra.mxu0 %v2762_v34  ;;  %v2808_v10 = vld [vmem:[#allocation5 + $0x4e4] ss:$16 sps:$4 sm:$0xff]   ;;  %v3323_v12 = vpack.c.bf16 %v101_v7, %v94_v6  ;;  %v3325_v13 = vpack.c.bf16 %v103_v9, %v96_v8  ;;  %v2806_v14 = vld [vmem:[#allocation5 + $0x4e0] ss:$16 sps:$4 sm:$0xff]   ;;  %v2835_v34 = vld [vmem:[#allocation5 + $0x8c] ss:$16 sps:$4 sm:$0xff]  }
  0x64   :  { %1377 = vmatpush2.bf16.msra.mxu1 %v2763_v35  ;;  %1335 = vmatprep.subr.bf16.mxu0 %v2764_v36  ;;  %v2811_v11 = vld [vmem:[#allocation5 + $0x604] ss:$16 sps:$4 sm:$0xff]   ;;  %v2809_v15 = vld [vmem:[#allocation5 + $0x600] ss:$16 sps:$4 sm:$0xff]   ;;  %v2833_v36 = vld [vmem:[#allocation5 + $0x88] ss:$16 sps:$4 sm:$0xff]  }
  0x65   :  { %1378 = vmatprep.subr.bf16.mxu1 %v2766_v37  ;;  %v2814_v16 = vld [vmem:[#allocation5 + $0x4c4] ss:$16 sps:$4 sm:$0xff]   ;;  %v2812_v18 = vld [vmem:[#allocation5 + $0x4c0] ss:$16 sps:$4 sm:$0xff]   ;;  %v2883_v6 = vld [vmem:[#allocation5 + $0x18c] ss:$16 sps:$4 sm:$0xff]  }
  0x66   :  { %v100_v19 = vld [vmem:[#allocation2 + $0x30] sm:$0xff]  ;;  %v2881_v8 = vld [vmem:[#allocation5 + $0x188] ss:$16 sps:$4 sm:$0xff]  }
  0x67   :  { %1336 = vmatpush2.bf16.msra.mxu0 %v2768_v38  ;;  %v2820_v22 = vld [vmem:[#allocation5 + $0x4a4] ss:$16 sps:$4 sm:$0xff]   ;;  %v3330_v23 = vpack.c.bf16 %v107_v20, %v100_v19  ;;  %v2818_v25 = vld [vmem:[#allocation5 + $0x4a0] ss:$16 sps:$4 sm:$0xff]   ;;  %v2841_v38 = vld [vmem:[#allocation5 + $0x6c] ss:$16 sps:$4 sm:$0xff]  }
  0x68   :  { %1379 = vmatpush2.bf16.msra.mxu1 %v2769_v39  ;;  %1337 = vmatprep.subr.bf16.mxu0 %v2770_v40  ;;  %v2826_v27 = vld [vmem:[#allocation5 + $0x484] ss:$16 sps:$4 sm:$0xff]   ;;  %v2824_v29 = vld [vmem:[#allocation5 + $0x480] ss:$16 sps:$4 sm:$0xff]   ;;  %v2839_v40 = vld [vmem:[#allocation5 + $0x68] ss:$16 sps:$4 sm:$0xff]  }
  0x69   :  { %1380 = vmatprep.subr.bf16.mxu1 %v2772_v41  ;;  %v2832_v31 = vld [vmem:[#allocation5 + $0x464] ss:$16 sps:$4 sm:$0xff]   ;;  %v2830_v33 = vld [vmem:[#allocation5 + $0x460] ss:$16 sps:$4 sm:$0xff]   ;;  %v99_v41 = vld [vmem:[#allocation2 + $0x28] sm:$0xff] }
  0x6a   :  { %v2838_v35 = vld [vmem:[#allocation5 + $0x444] ss:$16 sps:$4 sm:$0xff]   ;;  %v2836_v37 = vld [vmem:[#allocation5 + $0x440] ss:$16 sps:$4 sm:$0xff]  }
  0x6b   :  { %1338 = vmatpush2.bf16.msra.mxu0 %v2774_v42  ;;  %v2844_v39 = vld [vmem:[#allocation5 + $0x424] ss:$16 sps:$4 sm:$0xff]   ;;  %v2848_v48 = vld [vmem:[#allocation5 + $0x400] ss:$16 sps:$4 sm:$0xff]  }
  0x6c   :  { %1381 = vmatpush2.bf16.msra.mxu1 %v2775_v43  ;;  %1339 = vmatprep.subr.bf16.mxu0 %v2776_v44  ;;  %v106_v42 = vld [vmem:[#allocation2 + $0x60] sm:$0xff] }
  0x6d   :  { %1382 = vmatprep.subr.bf16.mxu1 %v2778_v45  ;;  %v2842_v43 = vld [vmem:[#allocation5 + $0x420] ss:$16 sps:$4 sm:$0xff]   ;;  %v3335_v44 = vpack.c.bf16 %v106_v42, %v99_v41  ;;  %v2847_v45 = vld [vmem:[#allocation5 + $0x4c] ss:$16 sps:$4 sm:$0xff]   ;;  %v2850_v46 = vld [vmem:[#allocation5 + $0x404] ss:$16 sps:$4 sm:$0xff]  }
  0x6e   :  { %v2886_v7 = vld [vmem:[#allocation5 + $0x544] ss:$16 sps:$4 sm:$0xff]   ;;  %v2884_v9 = vld [vmem:[#allocation5 + $0x540] ss:$16 sps:$4 sm:$0xff]   ;;  %v2925_v41 = vld [vmem:[#allocation5 + $0x4ac] ss:$16 sps:$4 sm:$0xff]  }
  0x6f   :  { %1340 = vmatpush2.bf16.msra.mxu0 %v2780_v50  ;;  %v2856_v50 = vld [vmem:[#allocation5 + $0x5e4] ss:$16 sps:$4 sm:$0xff]   ;;  %v2896_v19 = vld [vmem:[#allocation5 + $0x500] ss:$16 sps:$4 sm:$0xff]   ;;  %v2928_v42 = vld [vmem:[#allocation5 + $0x26c] ss:$16 sps:$4 sm:$0xff]  }
  0x70   :  { %1383 = vmatpush2.bf16.msra.mxu1 %v2781_v51  ;;  %1341 = vmatprep.subr.bf16.mxu0 %v2782_v52  ;;  %v2851_v51 = vld [vmem:[#allocation5 + $0x28] ss:$16 sps:$4 sm:$0xff]   ;;  %v2854_v52 = vld [vmem:[#allocation5 + $0x5e0] ss:$16 sps:$4 sm:$0xff]  }
  0x71   :  { %1384 = vmatprep.subr.bf16.mxu1 %v2784_v55  ;;  %v2862_v55 = vld [vmem:[#allocation5 + $0x5c4] ss:$16 sps:$4 sm:$0xff]  }
  0x72   :  { %v98_v20 = vld [vmem:[#allocation2 + $0x20] sm:$0xff] }
  0x73   :  { %1342 = vmatpush2.bf16.msra.mxu0 %v2786_v56  ;;  %v2857_v56 = vld [vmem:[#allocation5 + $0x8] ss:$16 sps:$4 sm:$0xff]  }
  0x74   :  { %1385 = vmatpush2.bf16.msra.mxu1 %v2787_v57  ;;  %1343 = vmatprep.subr.bf16.mxu0 %v2788_v58  ;;  %v2860_v57 = vld [vmem:[#allocation5 + $0x5c0] ss:$16 sps:$4 sm:$0xff]   ;;  %v2865_v58 = vld [vmem:[#allocation5 + $0x1ec] ss:$16 sps:$4 sm:$0xff]  }
  0x75   :  { %1386 = vmatprep.subr.bf16.mxu1 %v2790_v59  ;;  %v2868_v59 = vld [vmem:[#allocation5 + $0x5a4] ss:$16 sps:$4 sm:$0xff]  }
  0x77   :  { %1344 = vmatpush2.bf16.msra.mxu0 %v2792_v60  ;;  %v2863_v60 = vld [vmem:[#allocation5 + $0x1e8] ss:$16 sps:$4 sm:$0xff]  }
  0x78   :  { %1387 = vmatpush2.bf16.msra.mxu1 %v2793_v61  ;;  %1345 = vmatprep.subr.bf16.mxu0 %v2794_v62  ;;  %v2866_v61 = vld [vmem:[#allocation5 + $0x5a0] ss:$16 sps:$4 sm:$0xff]   ;;  %v2871_v62 = vld [vmem:[#allocation5 + $0x1cc] ss:$16 sps:$4 sm:$0xff]  }
  0x79   :  { %1388 = vmatprep.subr.bf16.mxu1 %v2796_v63  ;;  %v2874_v63 = vld [vmem:[#allocation5 + $0x584] ss:$16 sps:$4 sm:$0xff]  }
  0x7b   :  { %1346 = vmatpush2.bf16.msra.mxu0 %v2798_v0  ;;  %v2869_v0 = vld [vmem:[#allocation5 + $0x1c8] ss:$16 sps:$4 sm:$0xff]  }
  0x7c   :  { %1389 = vmatpush2.bf16.msra.mxu1 %v2799_v1  ;;  %1347 = vmatprep.subr.bf16.mxu0 %v2800_v2  ;;  %v2872_v1 = vld [vmem:[#allocation5 + $0x580] ss:$16 sps:$4 sm:$0xff]   ;;  %v2877_v2 = vld [vmem:[#allocation5 + $0x1ac] ss:$16 sps:$4 sm:$0xff]  }
  0x7d   :  { %1390 = vmatprep.subr.bf16.mxu1 %v2802_v3  ;;  %v2880_v3 = vld [vmem:[#allocation5 + $0x564] ss:$16 sps:$4 sm:$0xff]  }
  0x7f   :  { %1348 = vmatpush2.bf16.msra.mxu0 %v2804_v4  ;;  %v2875_v4 = vld [vmem:[#allocation5 + $0x1a8] ss:$16 sps:$4 sm:$0xff]  }
  0x80   :  { %1391 = vmatpush2.bf16.msra.mxu1 %v2805_v5  ;;  %1403 = vmatprep.subr.bf16.mxu0 %v2808_v10  ;;  %v2878_v5 = vld [vmem:[#allocation5 + $0x560] ss:$16 sps:$4 sm:$0xff]   ;;  %v2889_v10 = vld [vmem:[#allocation5 + $0x16c] ss:$16 sps:$4 sm:$0xff]  }
  0x81   :  { %1460 = vmatprep.subr.bf16.mxu1 %v2811_v11  ;;  %v2892_v11 = vld [vmem:[#allocation5 + $0x524] ss:$16 sps:$4 sm:$0xff]  }
  0x82   :  { %1350 = vmatmul.mubr.bf16.vlgmr.msra.gmra.mxu0 %v3323_v12 }
  0x83   :  { %1393 = vmatmul.mubr.bf16.vlgmr.msra.gmra.mxu1 %v3325_v13  ;;  %1404 = vmatpush1.bf16.msra.mxu0 %v2806_v14  ;;  %v2887_v14 = vld [vmem:[#allocation5 + $0x168] ss:$16 sps:$4 sm:$0xff]  }
  0x84   :  { %1461 = vmatpush1.bf16.msra.mxu1 %v2809_v15  ;;  %1405 = vmatprep.subr.bf16.mxu0 %v2814_v16  ;;  %v2890_v15 = vld [vmem:[#allocation5 + $0x520] ss:$16 sps:$4 sm:$0xff]   ;;  %v2895_v16 = vld [vmem:[#allocation5 + $0x14c] ss:$16 sps:$4 sm:$0xff]  }
  0x85   :  { %1478 = vmatprep.mubr.bf16.mxu1 %v3257_v21  ;;  %1489 = vmatprep.subr.bf16.mxu1 %v2817_v17  ;;  %v2898_v17 = vld [vmem:[#allocation5 + $0x504] ss:$16 sps:$4 sm:$0xff]  }
  0x86   :  { %1435 = vmatprep.mubr.bf16.mxu0 %v3335_v44 }
  0x87   :  { %1406 = vmatpush1.bf16.msra.mxu0 %v2812_v18  ;;  %v2893_v18 = vld [vmem:[#allocation5 + $0x148] ss:$16 sps:$4 sm:$0xff]  }
  0x88   :  { %1407 = vmatprep.subr.bf16.mxu0 %v2820_v22  ;;  %v105_v22 = vld [vmem:[#allocation2 + $0x58] sm:$0xff] }
  0x8b   :  { %2590 = vmatmul.mubr.msk.bf16.vlgmr.msra.gmra.mxu1 %vm1313_vm0, %v3330_v23  ;;  %1408 = vmatpush1.bf16.msra.mxu0 %v2818_v25  ;;  %v2904_v25 = vld [vmem:[#allocation5 + $0x2ec] ss:$16 sps:$4 sm:$0xff]  }
  0x8c   :  { %1490 = vmatpush1.bf16.msra.mxu1 %v2815_v24  ;;  %1409 = vmatprep.subr.bf16.mxu0 %v2826_v27  ;;  %v2901_v24 = vld [vmem:[#allocation5 + $0x12c] ss:$16 sps:$4 sm:$0xff]   ;;  %v2899_v27 = vld [vmem:[#allocation5 + $0x128] ss:$16 sps:$4 sm:$0xff]  }
  0x8d   :  { %1491 = vmatprep.subr.bf16.mxu1 %v2823_v26  ;;  %1521 = vmatprep.mubr.bf16.mxu1 %v3317_v53  ;;  %v2859_v53 = vld [vmem:[#allocation5 + $0xc] ss:$16 sps:$4 sm:$0xff]   ;;  %v3338_v26 = vpack.c.bf16 %v105_v22, %v98_v20  ;;  %v2983_v20 = vld [vmem:[#allocation5 + $0x568] ss:$16 sps:$4 sm:$0xff]  }
  0x8e   :  { %v2986_v22 = vld [vmem:[#allocation5 + $0x328] ss:$16 sps:$4 sm:$0xff]  }
  0x8f   :  { %1410 = vmatpush1.bf16.msra.mxu0 %v2824_v29  ;;  %v2907_v29 = vld [vmem:[#allocation5 + $0x10c] ss:$16 sps:$4 sm:$0xff]  }
  0x90   :  { %1492 = vmatpush1.bf16.msra.mxu1 %v2821_v28  ;;  %1411 = vmatprep.subr.bf16.mxu0 %v2832_v31  ;;  %v2902_v28 = vld [vmem:[#allocation5 + $0x2e8] ss:$16 sps:$4 sm:$0xff]  }
  0x91   :  { %1493 = vmatprep.subr.bf16.mxu1 %v2829_v30  ;;  %v2910_v30 = vld [vmem:[#allocation5 + $0x2cc] ss:$16 sps:$4 sm:$0xff]   ;;  %v2905_v31 = vld [vmem:[#allocation5 + $0x108] ss:$16 sps:$4 sm:$0xff]  }
  0x93   :  { %1412 = vmatpush1.bf16.msra.mxu0 %v2830_v33  ;;  %v2913_v33 = vld [vmem:[#allocation5 + $0x4ec] ss:$16 sps:$4 sm:$0xff]  }
  0x94   :  { %1494 = vmatpush1.bf16.msra.mxu1 %v2827_v32  ;;  %1413 = vmatprep.subr.bf16.mxu0 %v2838_v35  ;;  %v2908_v32 = vld [vmem:[#allocation5 + $0x2c8] ss:$16 sps:$4 sm:$0xff]  }
  0x95   :  { %1495 = vmatprep.subr.bf16.mxu1 %v2835_v34  ;;  %v2916_v34 = vld [vmem:[#allocation5 + $0x2ac] ss:$16 sps:$4 sm:$0xff]   ;;  %v2911_v35 = vld [vmem:[#allocation5 + $0x4e8] ss:$16 sps:$4 sm:$0xff]  }
  0x97   :  { %1414 = vmatpush1.bf16.msra.mxu0 %v2836_v37  ;;  %v2919_v37 = vld [vmem:[#allocation5 + $0x4cc] ss:$16 sps:$4 sm:$0xff]  }
  0x98   :  { %1496 = vmatpush1.bf16.msra.mxu1 %v2833_v36  ;;  %1415 = vmatprep.subr.bf16.mxu0 %v2844_v39  ;;  %v2914_v36 = vld [vmem:[#allocation5 + $0x2a8] ss:$16 sps:$4 sm:$0xff]  }
  0x99   :  { %1497 = vmatprep.subr.bf16.mxu1 %v2841_v38  ;;  %v2922_v38 = vld [vmem:[#allocation5 + $0x28c] ss:$16 sps:$4 sm:$0xff]   ;;  %v2917_v39 = vld [vmem:[#allocation5 + $0x4c8] ss:$16 sps:$4 sm:$0xff]  }
  0x9b   :  { %1416 = vmatpush1.bf16.msra.mxu0 %v2842_v43  ;;  %v2923_v43 = vld [vmem:[#allocation5 + $0x4a8] ss:$16 sps:$4 sm:$0xff]  }
  0x9c   :  { %1498 = vmatpush1.bf16.msra.mxu1 %v2839_v40  ;;  %1417 = vmatprep.subr.bf16.mxu0 %v2850_v46  ;;  %v2920_v40 = vld [vmem:[#allocation5 + $0x288] ss:$16 sps:$4 sm:$0xff]   ;;  %v2934_v46 = vld [vmem:[#allocation5 + $0x24c] ss:$16 sps:$4 sm:$0xff]  }
  0x9d   :  { %1499 = vmatprep.subr.bf16.mxu1 %v2847_v45  ;;  %v2926_v45 = vld [vmem:[#allocation5 + $0x268] ss:$16 sps:$4 sm:$0xff]  }
  0x9f   :  { %1418 = vmatpush1.bf16.msra.mxu0 %v2848_v48  ;;  %v2937_v48 = vld [vmem:[#allocation5 + $0x46c] ss:$16 sps:$4 sm:$0xff]  }
  0xa0   :  { %1500 = vmatpush1.bf16.msra.mxu1 %v2845_v47  ;;  %1419 = vmatprep.subr.bf16.mxu0 %v2856_v50  ;;  %v2929_v47 = vld [vmem:[#allocation5 + $0x488] ss:$16 sps:$4 sm:$0xff]  }
  0xa1   :  { %1501 = vmatprep.subr.bf16.mxu1 %v2853_v49  ;;  %v2940_v49 = vld [vmem:[#allocation5 + $0x22c] ss:$16 sps:$4 sm:$0xff]   ;;  %v2935_v50 = vld [vmem:[#allocation5 + $0x468] ss:$16 sps:$4 sm:$0xff]  }
  0xa3   :  { %1420 = vmatpush2.bf16.msra.mxu0 %v2854_v52  ;;  %v2943_v52 = vld [vmem:[#allocation5 + $0x44c] ss:$16 sps:$4 sm:$0xff]  }
  0xa4   :  { %1502 = vmatpush1.bf16.msra.mxu1 %v2851_v51  ;;  %1421 = vmatprep.subr.bf16.mxu0 %v2862_v55  ;;  %v2938_v51 = vld [vmem:[#allocation5 + $0x228] ss:$16 sps:$4 sm:$0xff]  }
  0xa5   :  { %1503 = vmatprep.subr.bf16.mxu1 %v2859_v53  ;;  %v2941_v53 = vld [vmem:[#allocation5 + $0x448] ss:$16 sps:$4 sm:$0xff]  }
  0xa6   :  { %v2944_v55 = vld [vmem:[#allocation5 + $0x208] ss:$16 sps:$4 sm:$0xff]  }
  0xa7   :  { %1422 = vmatpush2.bf16.msra.mxu0 %v2860_v57  ;;  %v2952_v57 = vld [vmem:[#allocation5 + $0x3ec] ss:$16 sps:$4 sm:$0xff]  }
  0xa8   :  { %1504 = vmatpush1.bf16.msra.mxu1 %v2857_v56  ;;  %1423 = vmatprep.subr.bf16.mxu0 %v2868_v59  ;;  %v2949_v56 = vld [vmem:[#allocation5 + $0x42c] ss:$16 sps:$4 sm:$0xff]   ;;  %v2950_v59 = vld [vmem:[#allocation5 + $0x3e8] ss:$16 sps:$4 sm:$0xff]  }
  0xa9   :  { %1505 = vmatprep.subr.bf16.mxu1 %v2865_v58  ;;  %v2947_v58 = vld [vmem:[#allocation5 + $0x428] ss:$16 sps:$4 sm:$0xff]  }
  0xab   :  { %1424 = vmatpush2.bf16.msra.mxu0 %v2866_v61  ;;  %v2958_v61 = vld [vmem:[#allocation5 + $0x3cc] ss:$16 sps:$4 sm:$0xff]  }
  0xac   :  { %1506 = vmatpush2.bf16.msra.mxu1 %v2863_v60  ;;  %1425 = vmatprep.subr.bf16.mxu0 %v2874_v63  ;;  %v2955_v60 = vld [vmem:[#allocation5 + $0x40c] ss:$16 sps:$4 sm:$0xff]   ;;  %v2956_v63 = vld [vmem:[#allocation5 + $0x3c8] ss:$16 sps:$4 sm:$0xff]  }
  0xad   :  { %1507 = vmatprep.subr.bf16.mxu1 %v2871_v62  ;;  %v2953_v62 = vld [vmem:[#allocation5 + $0x408] ss:$16 sps:$4 sm:$0xff]  }
  0xaf   :  { %1426 = vmatpush2.bf16.msra.mxu0 %v2872_v1  ;;  %v2964_v1 = vld [vmem:[#allocation5 + $0x3ac] ss:$16 sps:$4 sm:$0xff]  }
  0xb0   :  { %1508 = vmatpush2.bf16.msra.mxu1 %v2869_v0  ;;  %1427 = vmatprep.subr.bf16.mxu0 %v2880_v3  ;;  %v2961_v0 = vld [vmem:[#allocation5 + $0x5ec] ss:$16 sps:$4 sm:$0xff]   ;;  %v2962_v3 = vld [vmem:[#allocation5 + $0x3a8] ss:$16 sps:$4 sm:$0xff]  }
  0xb1   :  { %1509 = vmatprep.subr.bf16.mxu1 %v2877_v2  ;;  %v2959_v2 = vld [vmem:[#allocation5 + $0x5e8] ss:$16 sps:$4 sm:$0xff]  }
  0xb3   :  { %1428 = vmatpush2.bf16.msra.mxu0 %v2878_v5  ;;  %v2970_v5 = vld [vmem:[#allocation5 + $0x38c] ss:$16 sps:$4 sm:$0xff]  }
  0xb4   :  { %1510 = vmatpush2.bf16.msra.mxu1 %v2875_v4  ;;  %1429 = vmatprep.subr.bf16.mxu0 %v2886_v7  ;;  %v2967_v4 = vld [vmem:[#allocation5 + $0x5cc] ss:$16 sps:$4 sm:$0xff]   ;;  %v2968_v7 = vld [vmem:[#allocation5 + $0x388] ss:$16 sps:$4 sm:$0xff]  }
  0xb5   :  { %1511 = vmatprep.subr.bf16.mxu1 %v2883_v6  ;;  %v2965_v6 = vld [vmem:[#allocation5 + $0x5c8] ss:$16 sps:$4 sm:$0xff]  }
  0xb7   :  { %1430 = vmatpush2.bf16.msra.mxu0 %v2884_v9  ;;  %v2976_v9 = vld [vmem:[#allocation5 + $0x36c] ss:$16 sps:$4 sm:$0xff]  }
  0xb8   :  { %1512 = vmatpush2.bf16.msra.mxu1 %v2881_v8  ;;  %1431 = vmatprep.subr.bf16.mxu0 %v2892_v11  ;;  %v2973_v8 = vld [vmem:[#allocation5 + $0x5ac] ss:$16 sps:$4 sm:$0xff]   ;;  %v2974_v11 = vld [vmem:[#allocation5 + $0x368] ss:$16 sps:$4 sm:$0xff]  }
  0xb9   :  { %1513 = vmatprep.subr.bf16.mxu1 %v2889_v10  ;;  %v2971_v10 = vld [vmem:[#allocation5 + $0x5a8] ss:$16 sps:$4 sm:$0xff]  }
  0xbb   :  { %1432 = vmatpush2.bf16.msra.mxu0 %v2890_v15  ;;  %v2982_v15 = vld [vmem:[#allocation5 + $0x34c] ss:$16 sps:$4 sm:$0xff]  }
  0xbc   :  { %1514 = vmatpush2.bf16.msra.mxu1 %v2887_v14  ;;  %1433 = vmatprep.subr.bf16.mxu0 %v2898_v17  ;;  %v2979_v14 = vld [vmem:[#allocation5 + $0x58c] ss:$16 sps:$4 sm:$0xff]   ;;  %v2980_v17 = vld [vmem:[#allocation5 + $0x348] ss:$16 sps:$4 sm:$0xff]  }
  0xbd   :  { %1515 = vmatprep.subr.bf16.mxu1 %v2895_v16  ;;  %v2977_v16 = vld [vmem:[#allocation5 + $0x588] ss:$16 sps:$4 sm:$0xff]  }
  0xbf   :  { %1434 = vmatpush2.bf16.msra.mxu0 %v2896_v19  ;;  %v2988_v19 = vld [vmem:[#allocation5 + $0x32c] ss:$16 sps:$4 sm:$0xff]  }
  0xc0   :  { %1516 = vmatpush2.bf16.msra.mxu1 %v2893_v18  ;;  %1532 = vmatprep.subr.bf16.mxu0 %v2904_v25  ;;  %v2985_v18 = vld [vmem:[#allocation5 + $0x56c] ss:$16 sps:$4 sm:$0xff]  }
  0xc1   :  { %1517 = vmatprep.subr.bf16.mxu1 %v2901_v24  ;;  %v2991_v24 = vld [vmem:[#allocation5 + $0x54c] ss:$16 sps:$4 sm:$0xff]  }
  0xc2   :  { %1436 = vmatmul.mubr.bf16.vlgmr.msra.gmra.mxu0 %v3338_v26  ;;  %v2994_v25 = vld [vmem:[#allocation5 + $0x30c] ss:$16 sps:$4 sm:$0xff]  }
  0xc3   :  { %1533 = vmatpush1.bf16.msra.mxu0 %v2902_v28  ;;  %1564 = vmatprep.mubr.bf16.mxu0 %v3319_v54  ;;  %v2931_v54 = vld [vmem:[#allocation5 + $0x48c] ss:$16 sps:$4 sm:$0xff]   ;;  %v2992_v28 = vld [vmem:[#allocation5 + $0x308] ss:$16 sps:$4 sm:$0xff]  }
  0xc4   :  { %1518 = vmatpush2.bf16.msra.mxu1 %v2899_v27  ;;  %1534 = vmatprep.subr.bf16.mxu0 %v2910_v30  ;;  %v2989_v27 = vld [vmem:[#allocation5 + $0x548] ss:$16 sps:$4 sm:$0xff]  }
  0xc5   :  { %1519 = vmatprep.subr.bf16.mxu1 %v2907_v29  ;;  %v2997_v29 = vld [vmem:[#allocation5 + $0x52c] ss:$16 sps:$4 sm:$0xff]   ;;  %v3006_v30 = vld [vmem:[#allocation8 + $0x74] ss:$8 sps:$4 sm:$0xff]  }
  0xc7   :  { %1535 = vmatpush1.bf16.msra.mxu0 %v2908_v32  ;;  %v3004_v32 = vld [vmem:[#allocation8 + $0x70] ss:$8 sps:$4 sm:$0xff]  }
  0xc8   :  { %1520 = vmatpush2.bf16.msra.mxu1 %v2905_v31  ;;  %1536 = vmatprep.subr.bf16.mxu0 %v2916_v34  ;;  %v2995_v31 = vld [vmem:[#allocation5 + $0x528] ss:$16 sps:$4 sm:$0xff]  }
  0xc9   :  { %1575 = vmatprep.subr.bf16.mxu1 %v2913_v33  ;;  %v3000_v33 = vld [vmem:[#allocation5 + $0x50c] ss:$16 sps:$4 sm:$0xff]   ;;  %v3009_v34 = vld [vmem:[#allocation8 + $0x64] ss:$8 sps:$4 sm:$0xff]  }
  0xcb   :  { %1522 = vmatmul.mubr.bf16.vlgmr.msra.gmra.mxu1 %v3323_v12  ;;  %1537 = vmatpush1.bf16.msra.mxu0 %v2914_v36  ;;  %v2932_v12 = vld [vmem:[#allocation5 + $0x248] ss:$16 sps:$4 sm:$0xff]   ;;  %v3007_v36 = vld [vmem:[#allocation8 + $0x60] ss:$8 sps:$4 sm:$0xff]  }
  0xcc   :  { %1576 = vmatpush1.bf16.msra.mxu1 %v2911_v35  ;;  %1538 = vmatprep.subr.bf16.mxu0 %v2922_v38  ;;  %v2998_v35 = vld [vmem:[#allocation5 + $0x508] ss:$16 sps:$4 sm:$0xff]  }
  0xcd   :  { %1577 = vmatprep.subr.bf16.mxu1 %v2919_v37  ;;  %1607 = vmatprep.mubr.bf16.mxu1 %v3335_v44  ;;  %v2946_v44 = vld [vmem:[#allocation5 + $0x20c] ss:$16 sps:$4 sm:$0xff]   ;;  %v3012_v38 = vld [vmem:[#allocation8 + $0x54] ss:$8 sps:$4 sm:$0xff]  }
  0xce   :  { %v3003_v37 = vld [vmem:[#allocation5 + $0x60c] ss:$16 sps:$4 sm:$0xff]  }
  0xcf   :  { %1539 = vmatpush1.bf16.msra.mxu0 %v2920_v40  ;;  %v3010_v40 = vld [vmem:[#allocation8 + $0x50] ss:$8 sps:$4 sm:$0xff]  }
  0xd0   :  { %1578 = vmatpush1.bf16.msra.mxu1 %v2917_v39  ;;  %1540 = vmatprep.subr.bf16.mxu0 %v2928_v42  ;;  %v3001_v39 = vld [vmem:[#allocation5 + $0x608] ss:$16 sps:$4 sm:$0xff]  }
  0xd1   :  { %1579 = vmatprep.subr.bf16.mxu1 %v2925_v41  ;;  %v3015_v41 = vld [vmem:[#allocation8 + $0x44] ss:$8 sps:$4 sm:$0xff]   ;;  %v3018_v42 = vld [vmem:[#allocation8 + $0x34] ss:$8 sps:$4 sm:$0xff]  }
  0xd3   :  { %1541 = vmatpush1.bf16.msra.mxu0 %v2926_v45  ;;  %v3021_v45 = vld [vmem:[#allocation8 + $0x24] ss:$8 sps:$4 sm:$0xff]  }
  0xd4   :  { %1580 = vmatpush1.bf16.msra.mxu1 %v2923_v43  ;;  %1542 = vmatprep.subr.bf16.mxu0 %v2934_v46  ;;  %v3016_v43 = vld [vmem:[#allocation8 + $0x30] ss:$8 sps:$4 sm:$0xff]   ;;  %v3024_v46 = vld [vmem:[#allocation8 + $0x14] ss:$8 sps:$4 sm:$0xff]  }
  0xd5   :  { %1581 = vmatprep.subr.bf16.mxu1 %v2931_v54  ;;  %v3019_v54 = vld [vmem:[#allocation8 + $0x20] ss:$8 sps:$4 sm:$0xff]  }
  0xd7   :  { %1543 = vmatpush1.bf16.msra.mxu0 %v2932_v12  ;;  %v3054_v12 = vld [vmem:[#allocation8 + $0x174] ss:$8 sps:$4 sm:$0xff]  }
  0xd8   :  { %1582 = vmatpush1.bf16.msra.mxu1 %v2929_v47  ;;  %1544 = vmatprep.subr.bf16.mxu0 %v2940_v49  ;;  %v3052_v47 = vld [vmem:[#allocation8 + $0x170] ss:$8 sps:$4 sm:$0xff]   ;;  %v3055_v49 = vld [vmem:[#allocation8 + $0x160] ss:$8 sps:$4 sm:$0xff]  }
  0xd9   :  { %1583 = vmatprep.subr.bf16.mxu1 %v2937_v48  ;;  %v3057_v48 = vld [vmem:[#allocation8 + $0x164] ss:$8 sps:$4 sm:$0xff]  }
  0xdb   :  { %1545 = vmatpush1.bf16.msra.mxu0 %v2938_v51  ;;  %v3060_v51 = vld [vmem:[#allocation8 + $0x154] ss:$8 sps:$4 sm:$0xff]  }
  0xdc   :  { %1584 = vmatpush1.bf16.msra.mxu1 %v2935_v50  ;;  %1546 = vmatprep.subr.bf16.mxu0 %v2946_v44  ;;  %v3025_v50 = vld [vmem:[#allocation8] ss:$8 sps:$4 sm:$0xff]   ;;  %v3028_v44 = vld [vmem:[#allocation8 + $0xf0] ss:$8 sps:$4 sm:$0xff]  }
  0xdd   :  { %1585 = vmatprep.subr.bf16.mxu1 %v2943_v52  ;;  %v3058_v52 = vld [vmem:[#allocation8 + $0x150] ss:$8 sps:$4 sm:$0xff]  }
  0xdf   :  { %1547 = vmatpush1.bf16.msra.mxu0 %v2944_v55  ;;  %v3033_v55 = vld [vmem:[#allocation8 + $0xe4] ss:$8 sps:$4 sm:$0xff]  }
  0xe0   :  { %1586 = vmatpush1.bf16.msra.mxu1 %v2941_v53  ;;  %1548 = vmatprep.subr.bf16.mxu0 %v2952_v57  ;;  %v3063_v53 = vld [vmem:[#allocation8 + $0x144] ss:$8 sps:$4 sm:$0xff]   ;;  %v3031_v57 = vld [vmem:[#allocation8 + $0xe0] ss:$8 sps:$4 sm:$0xff]  }
  0xe1   :  { %1587 = vmatprep.subr.bf16.mxu1 %v2949_v56  ;;  %v3061_v56 = vld [vmem:[#allocation8 + $0x140] ss:$8 sps:$4 sm:$0xff]  }
  0xe3   :  { %1549 = vmatpush2.bf16.msra.mxu0 %v2950_v59  ;;  %v3036_v59 = vld [vmem:[#allocation8 + $0xd4] ss:$8 sps:$4 sm:$0xff]  }
  0xe4   :  { %1588 = vmatpush1.bf16.msra.mxu1 %v2947_v58  ;;  %1550 = vmatprep.subr.bf16.mxu0 %v2958_v61  ;;  %v3066_v58 = vld [vmem:[#allocation8 + $0x134] ss:$8 sps:$4 sm:$0xff]   ;;  %v3034_v61 = vld [vmem:[#allocation8 + $0xd0] ss:$8 sps:$4 sm:$0xff]  }
  0xe5   :  { %1589 = vmatprep.subr.bf16.mxu1 %v2955_v60  ;;  %v3064_v60 = vld [vmem:[#allocation8 + $0x130] ss:$8 sps:$4 sm:$0xff]  }
  0xe7   :  { %1551 = vmatpush2.bf16.msra.mxu0 %v2956_v63  ;;  %v3039_v63 = vld [vmem:[#allocation8 + $0xc4] ss:$8 sps:$4 sm:$0xff]  }
  0xe8   :  { %1590 = vmatpush1.bf16.msra.mxu1 %v2953_v62  ;;  %1552 = vmatprep.subr.bf16.mxu0 %v2964_v1  ;;  %v3069_v62 = vld [vmem:[#allocation8 + $0x124] ss:$8 sps:$4 sm:$0xff]   ;;  %v3037_v1 = vld [vmem:[#allocation8 + $0xc0] ss:$8 sps:$4 sm:$0xff]  }
  0xe9   :  { %1591 = vmatprep.subr.bf16.mxu1 %v2961_v0  ;;  %v3067_v0 = vld [vmem:[#allocation8 + $0x120] ss:$8 sps:$4 sm:$0xff]  }
  0xeb   :  { %1553 = vmatpush2.bf16.msra.mxu0 %v2962_v3  ;;  %v3042_v3 = vld [vmem:[#allocation8 + $0xb4] ss:$8 sps:$4 sm:$0xff]  }
  0xec   :  { %1592 = vmatpush2.bf16.msra.mxu1 %v2959_v2  ;;  %1554 = vmatprep.subr.bf16.mxu0 %v2970_v5  ;;  %v3072_v2 = vld [vmem:[#allocation8 + $0x114] ss:$8 sps:$4 sm:$0xff]   ;;  %v3040_v5 = vld [vmem:[#allocation8 + $0xb0] ss:$8 sps:$4 sm:$0xff]  }
  0xed   :  { %1593 = vmatprep.subr.bf16.mxu1 %v2967_v4  ;;  %v3070_v4 = vld [vmem:[#allocation8 + $0x110] ss:$8 sps:$4 sm:$0xff]  }
  0xef   :  { %1555 = vmatpush2.bf16.msra.mxu0 %v2968_v7  ;;  %v3045_v7 = vld [vmem:[#allocation8 + $0xa4] ss:$8 sps:$4 sm:$0xff]  }
  0xf0   :  { %1594 = vmatpush2.bf16.msra.mxu1 %v2965_v6  ;;  %1556 = vmatprep.subr.bf16.mxu0 %v2976_v9  ;;  %v3075_v6 = vld [vmem:[#allocation8 + $0x104] ss:$8 sps:$4 sm:$0xff]   ;;  %v3043_v9 = vld [vmem:[#allocation8 + $0xa0] ss:$8 sps:$4 sm:$0xff]  }
  0xf1   :  { %1595 = vmatprep.subr.bf16.mxu1 %v2973_v8  ;;  %v3073_v8 = vld [vmem:[#allocation8 + $0x100] ss:$8 sps:$4 sm:$0xff]  }
  0xf3   :  { %1557 = vmatpush2.bf16.msra.mxu0 %v2974_v11  ;;  %v3046_v11 = vld [vmem:[#allocation8 + $0x90] ss:$8 sps:$4 sm:$0xff]  }
  0xf4   :  { %1596 = vmatpush2.bf16.msra.mxu1 %v2971_v10  ;;  %1558 = vmatprep.subr.bf16.mxu0 %v2982_v15  ;;  %v3048_v10 = vld [vmem:[#allocation8 + $0x94] ss:$8 sps:$4 sm:$0xff]   ;;  %v3049_v15 = vld [vmem:[#allocation8 + $0x80] ss:$8 sps:$4 sm:$0xff]  }
  0xf5   :  { %1597 = vmatprep.subr.bf16.mxu1 %v2979_v14  ;;  %v3051_v14 = vld [vmem:[#allocation8 + $0x84] ss:$8 sps:$4 sm:$0xff]  }
  0xf7   :  { %1559 = vmatpush2.bf16.msra.mxu0 %v2980_v17  ;;  %v3078_v17 = vld [vmem:[#allocation8 + $0x1f4] ss:$8 sps:$4 sm:$0xff]  }
  0xf8   :  { %1598 = vmatpush2.bf16.msra.mxu1 %v2977_v16  ;;  %1560 = vmatprep.subr.bf16.mxu0 %v2988_v19  ;;  %v3076_v16 = vld [vmem:[#allocation8 + $0x1f0] ss:$8 sps:$4 sm:$0xff]   ;;  %v3079_v19 = vld [vmem:[#allocation8 + $0x1e0] ss:$8 sps:$4 sm:$0xff]  }
  0xf9   :  { %1599 = vmatprep.subr.bf16.mxu1 %v2985_v18  ;;  %v3081_v18 = vld [vmem:[#allocation8 + $0x1e4] ss:$8 sps:$4 sm:$0xff]  }
  0xfb   :  { %1561 = vmatpush2.bf16.msra.mxu0 %v2986_v22  ;;  %v3082_v22 = vld [vmem:[#allocation8 + $0x1d0] ss:$8 sps:$4 sm:$0xff]  }
  0xfc   :  { %1600 = vmatpush2.bf16.msra.mxu1 %v2983_v20  ;;  %1562 = vmatprep.subr.bf16.mxu0 %v2994_v25  ;;  %v3084_v20 = vld [vmem:[#allocation8 + $0x1d4] ss:$8 sps:$4 sm:$0xff]   ;;  %v3085_v25 = vld [vmem:[#allocation8 + $0x1c0] ss:$8 sps:$4 sm:$0xff]  }
  0xfd   :  { %1601 = vmatprep.subr.bf16.mxu1 %v2991_v24  ;;  %v3087_v24 = vld [vmem:[#allocation8 + $0x1c4] ss:$8 sps:$4 sm:$0xff]  }
  0xff   :  { %1563 = vmatpush2.bf16.msra.mxu0 %v2992_v28  ;;  %v3088_v28 = vld [vmem:[#allocation8 + $0x1b0] ss:$8 sps:$4 sm:$0xff]  }
 0x100   :  { %1602 = vmatpush2.bf16.msra.mxu1 %v2989_v27  ;;  %2093 = vmatprep.subr.bf16.mxu0 %v3006_v30  ;;  %v3090_v27 = vld [vmem:[#allocation8 + $0x1b4] ss:$8 sps:$4 sm:$0xff]   ;;  %v3091_v30 = vld [vmem:[#allocation8 + $0x1a0] ss:$8 sps:$4 sm:$0xff]  }
 0x101   :  { %1603 = vmatprep.subr.bf16.mxu1 %v2997_v29  ;;  %v3093_v29 = vld [vmem:[#allocation8 + $0x1a4] ss:$8 sps:$4 sm:$0xff]  }
 0x102   :  { %1565 = vmatmul.mubr.bf16.vlgmr.msra.gmra.mxu0 %v3325_v13  ;;  %v3013_v13 = vld [vmem:[#allocation8 + $0x40] ss:$8 sps:$4 sm:$0xff]  }
 0x103   :  { %2094 = vmatpush1.bf16.msra.mxu0 %v3004_v32  ;;  %v3094_v32 = vld [vmem:[#allocation8 + $0x190] ss:$8 sps:$4 sm:$0xff]  }
 0x104   :  { %1604 = vmatpush2.bf16.msra.mxu1 %v2995_v31  ;;  %2095 = vmatprep.subr.bf16.mxu0 %v3009_v34  ;;  %v3096_v31 = vld [vmem:[#allocation8 + $0x194] ss:$8 sps:$4 sm:$0xff]   ;;  %v3099_v34 = vld [vmem:[#allocation8 + $0x184] ss:$8 sps:$4 sm:$0xff]  }
 0x105   :  { %1605 = vmatprep.subr.bf16.mxu1 %v3000_v33  ;;  %v3097_v33 = vld [vmem:[#allocation8 + $0x180] ss:$8 sps:$4 sm:$0xff]  }
 0x107   :  { %2096 = vmatpush1.bf16.msra.mxu0 %v3007_v36 }
 0x108   :  { %1606 = vmatpush2.bf16.msra.mxu1 %v2998_v35  ;;  %2097 = vmatprep.subr.bf16.mxu0 %v3012_v38  ;;  %v313_v35 = vlaneseq }
 0x109   :  { %1632 = vmatprep.subr.bf16.mxu1 %v3003_v37 }
 0x10a   :  { %v3349_v37 = vshrl.u32 %v313_v35, 7 }
 0x10b   :  { %1608 = vmatmul.mubr.bf16.vlgmr.msra.gmra.mxu1 %v3338_v26  ;;  %2098 = vmatpush1.bf16.msra.mxu0 %v3010_v40  ;;  %v3022_v26 = vld [vmem:[#allocation8 + $0x10] ss:$8 sps:$4 sm:$0xff]  }
 0x10c   :  { %1633 = vmatpush1.bf16.msra.mxu1 %v3001_v39  ;;  %1650 = vmatprep.mubr.bf16.mxu1 %v3257_v21  ;;  %v3027_v21 = vld [vmem:[#allocation8 + $0x4] ss:$8 sps:$4 sm:$0xff]   ;;  %v315_v40 = vsub.s32 0, %v3349_v37 }
 0x10d   :  { %2099 = vmatprep.subr.bf16.mxu0 %v3015_v41  ;;  %2136 = vmatprep.subr.bf16.mxu1 %v3054_v12  ;;  %v3352_v41 = vld [vmem:[#allocation7] sm:$0xf] }
 0x10f   :  { %2100 = vmatpush1.bf16.msra.mxu0 %v3013_v13 }
 0x110   :  { %2101 = vmatprep.subr.bf16.mxu0 %v3018_v42  ;;  %v319_v42 = vsub.s32 1, %v3349_v37 }
 0x113   :  { %2591 = vmatmul.mubr.msk.bf16.vlgmr.msra.gmra.mxu1 %vm1313_vm0, %v3330_v23  ;;  %2102 = vmatpush1.bf16.msra.mxu0 %v3016_v43  ;;  %v3030_v23 = vld [vmem:[#allocation8 + $0xf4] ss:$8 sps:$4 sm:$0xff]  }
 0x114   :  { %2103 = vmatprep.subr.bf16.mxu0 %v3021_v45  ;;  %2137 = vmatpush1.bf16.msra.mxu1 %v3052_v47  ;;  %v316_v45 = vrot.slane %v3352_v41, %v315_v40 }
 0x115   :  { %2138 = vmatprep.subr.bf16.mxu1 %v3057_v48 }
 0x117   :  { %2104 = vmatpush1.bf16.msra.mxu0 %v3019_v54 }
 0x118   :  { %2105 = vmatprep.subr.bf16.mxu0 %v3024_v46  ;;  %2139 = vmatpush1.bf16.msra.mxu1 %v3055_v49  ;;  %v320_v46 = vrot.slane %v3352_v41, %v319_v42 }
 0x119   :  { %2140 = vmatprep.subr.bf16.mxu1 %v3060_v51 }
 0x11b   :  { %2106 = vmatpush1.bf16.msra.mxu0 %v3022_v26 }
 0x11c   :  { %2107 = vmatprep.subr.bf16.mxu0 %v3027_v21  ;;  %2141 = vmatpush1.bf16.msra.mxu1 %v3058_v52 }
 0x11d   :  { %2142 = vmatprep.subr.bf16.mxu1 %v3063_v53 }
 0x11f   :  { %2108 = vmatpush1.bf16.msra.mxu0 %v3025_v50 }
 0x120   :  { %2109 = vmatprep.subr.bf16.mxu0 %v3030_v23  ;;  %2143 = vmatpush1.bf16.msra.mxu1 %v3061_v56 }
 0x121   :  { %2144 = vmatprep.subr.bf16.mxu1 %v3066_v58 }
 0x123   :  { %2110 = vmatpush2.bf16.msra.mxu0 %v3028_v44 }
 0x124   :  { %2111 = vmatprep.subr.bf16.mxu0 %v3033_v55  ;;  %2145 = vmatpush1.bf16.msra.mxu1 %v3064_v60 }
 0x125   :  { %2146 = vmatprep.subr.bf16.mxu1 %v3069_v62 }
 0x127   :  { %2112 = vmatpush2.bf16.msra.mxu0 %v3031_v57 }
 0x128   :  { %2113 = vmatprep.subr.bf16.mxu0 %v3036_v59  ;;  %2147 = vmatpush1.bf16.msra.mxu1 %v3067_v0 }
 0x129   :  { %2148 = vmatprep.subr.bf16.mxu1 %v3072_v2 }
 0x12b   :  { %2114 = vmatpush2.bf16.msra.mxu0 %v3034_v61 }
 0x12c   :  { %2115 = vmatprep.subr.bf16.mxu0 %v3039_v63  ;;  %2149 = vmatpush1.bf16.msra.mxu1 %v3070_v4 }
 0x12d   :  { %2150 = vmatprep.subr.bf16.mxu1 %v3075_v6 }
 0x12f   :  { %2116 = vmatpush2.bf16.msra.mxu0 %v3037_v1 }
 0x130   :  { %2117 = vmatprep.subr.bf16.mxu0 %v3042_v3  ;;  %2151 = vmatpush1.bf16.msra.mxu1 %v3073_v8 }
 0x131   :  { %2152 = vmatprep.subr.bf16.mxu1 %v3078_v17 }
 0x133   :  { %2118 = vmatpush2.bf16.msra.mxu0 %v3040_v5 }
 0x134   :  { %2119 = vmatprep.subr.bf16.mxu0 %v3045_v7  ;;  %2153 = vmatpush2.bf16.msra.mxu1 %v3076_v16 }
 0x135   :  { %2154 = vmatprep.subr.bf16.mxu1 %v3081_v18 }
 0x137   :  { %2120 = vmatpush2.bf16.msra.mxu0 %v3043_v9 }
 0x138   :  { %2121 = vmatprep.subr.bf16.mxu0 %v3048_v10  ;;  %2155 = vmatpush2.bf16.msra.mxu1 %v3079_v19 }
 0x139   :  { %2156 = vmatprep.subr.bf16.mxu1 %v3084_v20 }
 0x13b   :  { %2122 = vmatpush2.bf16.msra.mxu0 %v3046_v11 }
 0x13c   :  { %2123 = vmatprep.subr.bf16.mxu0 %v3051_v14  ;;  %2157 = vmatpush2.bf16.msra.mxu1 %v3082_v22 }
 0x13d   :  { %2158 = vmatprep.subr.bf16.mxu1 %v3087_v24 }
 0x13f   :  { %2124 = vmatpush2.bf16.msra.mxu0 %v3049_v15 }
 0x140   :  { %2159 = vmatpush2.bf16.msra.mxu1 %v3085_v25 }
 0x141   :  { %2160 = vmatprep.subr.bf16.mxu1 %v3090_v27 }
 0x142   :  { %v1351_v39 = vpop.f32.mrf.mxu0 }
 0x143   :  { %v1394_v36 = vpop.f32.mrf.mxu1  ;;  %v1352_v47 = vadd.f32 %v1351_v39, %v316_v45 }
 0x144   :  { %2161 = vmatpush2.bf16.msra.mxu1 %v3088_v28  ;;  %v1353_v43 = vpop.f32.mrf.mxu0 }
 0x145   :  { %2162 = vmatprep.subr.bf16.mxu1 %v3093_v29  ;;  %v1396_v38 = vpop.f32.mrf.mxu1  ;;  %v1354_v21 = vadd.f32 %v1353_v43, %v320_v46  ;;  %v1395_v49 = vadd.f32 %v1394_v36, %v1352_v47 }
 0x146   :  { %v1355_v26 = vpop.f32.mrf.mxu0 }
 0x147   :  { %v1398_v13 = vpop.f32.mrf.mxu1  ;;  %v1356_v50 = vadd.f32 %v1355_v26, %v316_v45  ;;  %v1397_v52 = vadd.f32 %v1396_v38, %v1354_v21 }
 0x148   :  { %2163 = vmatpush2.bf16.msra.mxu1 %v3091_v30  ;;  %v1357_v48 = vpop.f32.mrf.mxu0 }
 0x149   :  { %2164 = vmatprep.subr.bf16.mxu1 %v3096_v31  ;;  %v1400_v54 = vpop.f32.mrf.mxu1  ;;  %v1358_v44 = vadd.f32 %v1357_v48, %v320_v46  ;;  %v1399_v56 = vadd.f32 %v1398_v13, %v1356_v50  ;;  %v323_v31 = vsub.s32 2, %v3349_v37 }
 0x14b   :  { %v1480_v12 = vpop.f32.mrf.mxu1  ;;  %v1401_v61 = vadd.f32 %v1400_v54, %v1358_v44  ;;  %v324_v35 = vrot.slane %v3352_v41, %v323_v31  ;;  %v3110_v31 = vld [vmem:[#allocation10 + $0x50] sm:$0xff]  }
 0x14c   :  { %2165 = vmatpush2.bf16.msra.mxu1 %v3094_v32 }
 0x14d   :  { %2166 = vmatprep.subr.bf16.mxu1 %v3099_v34  ;;  %v1482_v51 = vpop.f32.mrf.mxu1 }
 0x14f   :  { %v1484_v59 = vpop.f32.mrf.mxu1 }
 0x150   :  { %2167 = vmatpush2.bf16.msra.mxu1 %v3097_v33  ;;  %v327_v33 = vsub.s32 3, %v3349_v37 }
 0x151   :  { %v1486_v5 = vpop.f32.mrf.mxu1 }
 0x152   :  { %v328_v39 = vrot.slane %v3352_v41, %v327_v33  ;;  %v3112_v33 = vld [vmem:[#allocation10 + $0x48] sm:$0xff]  }
 0x182   :  { %v1437_v23 = vpop.f32.mrf.mxu0 }
 0x183   :  { %v1438_v53 = vadd.f32 %v1437_v23, %v1395_v49 }
 0x184   :  { %v1439_v55 = vpop.f32.mrf.mxu0 }
 0x185   :  { %v1481_v57 = vadd.f32 %v1480_v12, %v1438_v53  ;;  %v1440_v58 = vadd.f32 %v1439_v55, %v1397_v52 }
 0x186   :  { %v1441_v60 = vpop.f32.mrf.mxu0 }
 0x187   :  { %v1483_v62 = vadd.f32 %v1482_v51, %v1440_v58  ;;  %v1442_v63 = vadd.f32 %v1441_v60, %v1399_v56  ;;  %v1661_v0 = vmax.f32 %v1481_v57, 0.0 }
 0x188   :  { %v1443_v1 = vpop.f32.mrf.mxu0 }
 0x189   :  { %v1662_v2 = vmax.f32 %v1483_v62, 0.0  ;;  %v1485_v3 = vadd.f32 %v1484_v59, %v1442_v63  ;;  %v1444_v4 = vadd.f32 %v1443_v1, %v1401_v61  ;;  %v1669_v9 = vmin.f32 %v1661_v0, 0.9921875 }
 0x18b   :  { %v1670_v6 = vmin.f32 %v1662_v2, 0.9921875  ;;  %v1665_v7 = vmax.f32 %v1485_v3, 0.0  ;;  %v1487_v8 = vadd.f32 %v1486_v5, %v1444_v4  ;;  %v1677_v17 = vmul.f32 8.0, %v1669_v9  ;;  %v1523_v28 = vpop.f32.mrf.mxu1 }
 0x18c   :  { %v1524_v43 = vadd.f32 %v1523_v28, %v324_v35  ;;  %v3107_v28 = vld [vmem:[#allocation10 + $0x20] sm:$0xff]  }
 0x18d   :  { %v1673_v10 = vmin.f32 %v1665_v7, 0.9921875  ;;  %v1666_v11 = vmax.f32 %v1487_v8, 0.0  ;;  %v1678_v14 = vmul.f32 8.0, %v1670_v6  ;;  %v1685_v24 = vfloor.f32 %v1677_v17  ;;  %v1525_v29 = vpop.f32.mrf.mxu1 }
 0x18e   :  { %v1526_v46 = vadd.f32 %v1525_v29, %v328_v39  ;;  %v3108_v29 = vld [vmem:[#allocation10 + $0x58] sm:$0xff]  }
 0x18f   :  { %v1681_v15 = vmul.f32 8.0, %v1673_v10  ;;  %v1674_v16 = vmin.f32 %v1666_v11, 0.9921875  ;;  %v1686_v20 = vfloor.f32 %v1678_v14  ;;  %v1527_v30 = vpop.f32.mrf.mxu1  ;;  %v3100_v10 = vld [vmem:[#allocation10 + $0x78] sm:$0xff]   ;;  %v3102_v14 = vld [vmem:[#allocation10 + $0x70] sm:$0xff]  }
 0x190   :  { %v1528_v12 = vadd.f32 %v1527_v30, %v324_v35  ;;  %v3101_v11 = vld [vmem:[#allocation10 + $0x38] sm:$0xff]   ;;  %2673 = vmatprep.subr.bf16.mxu0 %v3100_v10  ;;  %v3114_v35 = vld [vmem:[#allocation10 + $0x40] sm:$0xff]  }
 0x191   :  { %v1682_v18 = vmul.f32 8.0, %v1674_v16  ;;  %v1689_v19 = vfloor.f32 %v1681_v15  ;;  %v1529_v34 = vpop.f32.mrf.mxu1  ;;  %v3109_v30 = vld [vmem:[#allocation10 + $0x18] sm:$0xff]  }
 0x192   :  { %v1530_v51 = vadd.f32 %v1529_v34, %v328_v39  ;;  %v3113_v34 = vld [vmem:[#allocation10 + $0x8] sm:$0xff]  }
 0x193   :  { %v1690_v22 = vfloor.f32 %v1682_v18  ;;  %v1693_v27 = vpack.c.bf16 %v1689_v19, %v1685_v24  ;;  %v3103_v19 = vld [vmem:[#allocation10 + $0x30] sm:$0xff]   ;;  %v1761_v39 = vld [vmem:[%s3385_s4] sm:$0x3] }
 0x195   :  { %v1694_v25 = vpack.c.bf16 %v1690_v22, %v1686_v20  ;;  %v3104_v22 = vld [vmem:[#allocation10 + $0x68] sm:$0xff]  }
 0x197   :  { %2125 = vmatprep.mubr.bf16.mxu0 %v1694_v25  ;;  %v3105_v25 = vld [vmem:[#allocation10 + $0x28] sm:$0xff]  }
 0x198   :  { %2126 = vmatmul.mubr.bf16.vlgmr.msra.gmra.mxu0 %v1693_v27  ;;  %v3106_v27 = vld [vmem:[#allocation10 + $0x60] sm:$0xff]  }
 0x199   :  { %2674 = vmatpush3.bf16.msra.mxu0 %v3101_v11 }
 0x19a   :  { %2675 = vmatprep.subr.bf16.mxu0 %v3102_v14 }
 0x19d   :  { %2676 = vmatpush3.bf16.msra.mxu0 %v3103_v19 }
 0x19e   :  { %2677 = vmatprep.subr.bf16.mxu0 %v3104_v22 }
 0x1a1   :  { %2678 = vmatpush3.bf16.msra.mxu0 %v3105_v25 }
 0x1a2   :  { %2679 = vmatprep.subr.bf16.mxu0 %v3106_v27 }
 0x1a5   :  { %2680 = vmatpush3.bf16.msra.mxu0 %v3107_v28 }
 0x1a6   :  { %2681 = vmatprep.subr.bf16.mxu0 %v3108_v29 }
 0x1a9   :  { %2682 = vmatpush3.bf16.msra.mxu0 %v3109_v30 }
 0x1aa   :  { %2683 = vmatprep.subr.bf16.mxu0 %v3110_v31 }
 0x1c2   :  { %v1566_v32 = vpop.f32.mrf.mxu0 }
 0x1c3   :  { %v1567_v26 = vadd.f32 %v1566_v32, %v1524_v43  ;;  %v3111_v32 = vld [vmem:[#allocation10 + $0x10] sm:$0xff]   ;;  %v1766_v43 = vrot.slane %v1761_v39, %v315_v40 }
 0x1c4   :  { %v1568_v36 = vpop.f32.mrf.mxu0  ;;  %2684 = vmatpush3.bf16.msra.mxu0 %v3111_v32 }
 0x1c5   :  { %v1569_v21 = vadd.f32 %v1568_v36, %v1526_v46  ;;  %2685 = vmatprep.subr.bf16.mxu0 %v3112_v33  ;;  %v3115_v36 = vld [vmem:[#allocation10] sm:$0xff]  }
 0x1c6   :  { %v1570_v45 = vpop.f32.mrf.mxu0 }
 0x1c7   :  { %v1571_v23 = vadd.f32 %v1570_v45, %v1528_v12  ;;  %v1770_v45 = vrot.slane %v1761_v39, %v319_v42 }
 0x1c8   :  { %v1572_v49 = vpop.f32.mrf.mxu0  ;;  %2686 = vmatpush3.bf16.msra.mxu0 %v3113_v34 }
 0x1c9   :  { %v1573_v55 = vadd.f32 %v1572_v49, %v1530_v51  ;;  %2687 = vmatprep.subr.bf16.mxu0 %v3114_v35 }
 0x1cb   :  { %v1609_v38 = vpop.f32.mrf.mxu1 }
 0x1cc   :  { %v1610_v48 = vadd.f32 %v1609_v38, %v1567_v26  ;;  %2688 = vmatpush3.bf16.msra.mxu0 %v3115_v36 }
 0x1cd   :  { %v1611_v13 = vpop.f32.mrf.mxu1 }
 0x1ce   :  { %v1612_v52 = vadd.f32 %v1611_v13, %v1569_v21 }
 0x1cf   :  { %v1613_v54 = vpop.f32.mrf.mxu1 }
 0x1d0   :  { %v1614_v56 = vadd.f32 %v1613_v54, %v1571_v23 }
 0x1d1   :  { %v1615_v47 = vpop.f32.mrf.mxu1 }
 0x1d2   :  { %v1616_v59 = vadd.f32 %v1615_v47, %v1573_v55 }
 0x1d3   :  { %v1652_v50 = vpop.f32.mrf.mxu1 }
 0x1d4   :  { %v1653_v44 = vadd.f32 %v1652_v50, %v1610_v48 }
 0x1d5   :  { %v1654_v53 = vpop.f32.mrf.mxu1 }
 0x1d6   :  { %v1655_v41 = vadd.f32 %v1654_v53, %v1612_v52  ;;  %v1663_v57 = vmax.f32 %v1653_v44, 0.0 }
 0x1d7   :  { %v1656_v58 = vpop.f32.mrf.mxu1 }
 0x1d8   :  { %v1664_v60 = vmax.f32 %v1655_v41, 0.0  ;;  %v1657_v61 = vadd.f32 %v1656_v58, %v1614_v56  ;;  %v1671_v2 = vmin.f32 %v1663_v57, 0.9921875 }
 0x1d9   :  { %v1658_v62 = vpop.f32.mrf.mxu1 }
 0x1da   :  { %v1672_v63 = vmin.f32 %v1664_v60, 0.9921875  ;;  %v1667_v0 = vmax.f32 %v1657_v61, 0.0  ;;  %v1659_v1 = vadd.f32 %v1658_v62, %v1616_v59  ;;  %v1679_v8 = vmul.f32 8.0, %v1671_v2 }
 0x1dc   :  { %v1675_v3 = vmin.f32 %v1667_v0, 0.9921875  ;;  %v1668_v4 = vmax.f32 %v1659_v1, 0.0  ;;  %v1680_v5 = vmul.f32 8.0, %v1672_v63  ;;  %v1687_v18 = vfloor.f32 %v1679_v8 }
 0x1de   :  { %v1683_v6 = vmul.f32 8.0, %v1675_v3  ;;  %v1676_v7 = vmin.f32 %v1668_v4, 0.9921875  ;;  %v1688_v16 = vfloor.f32 %v1680_v5 }
 0x1e0   :  { %v1684_v9 = vmul.f32 8.0, %v1676_v7  ;;  %v1691_v15 = vfloor.f32 %v1683_v6  ;;  %v2656_v6 = vld [vmem:[%s3387_s6] ss:$0 sm:$0xff] }
 0x1e2   :  { %v1692_v17 = vfloor.f32 %v1684_v9  ;;  %v1695_v24 = vpack.c.bf16 %v1691_v15, %v1687_v18 }
 0x1e4   :  { %v1696_v20 = vpack.c.bf16 %v1692_v17, %v1688_v16 }
 0x1e6   :  { %2168 = vmatprep.mubr.bf16.mxu1 %v1696_v20 }
 0x1e7   :  { %2169 = vmatmul.mubr.bf16.vlgmr.msra.gmra.mxu1 %v1695_v24 }
 0x258   :  { %v2127_v38 = vpop.f32.mrf.mxu0 }
 0x259   :  { %v2128_v46 = vadd.f32 %v2127_v38, %v1766_v43 }
 0x25a   :  { %v2129_v13 = vpop.f32.mrf.mxu0 }
 0x25b   :  { %v2130_v47 = vadd.f32 %v2129_v13, %v1770_v45 }
 0x25c   :  { %v2131_v54 = vpop.f32.mrf.mxu0 }
 0x25d   :  { %v2132_v49 = vadd.f32 %v2131_v54, %v1766_v43 }
 0x25e   :  { %v2133_v21 = vpop.f32.mrf.mxu0 }
 0x25f   :  { %v2134_v52 = vadd.f32 %v2133_v21, %v1770_v45 }
 0x2a7   :  { %v2170_v26 = vpop.f32.mrf.mxu1 }
 0x2a8   :  { %v2171_v12 = vadd.f32 %v2170_v26, %v2128_v46 }
 0x2a9   :  { %v2172_v48 = vpop.f32.mrf.mxu1 }
 0x2aa   :  { %v2173_v50 = vadd.f32 %v2172_v48, %v2130_v47  ;;  %v2179_v51 = vmax.f32 %v2171_v12, 0.0 }
 0x2ab   :  { %v2174_v23 = vpop.f32.mrf.mxu1 }
 0x2ac   :  { %v2180_v44 = vmax.f32 %v2173_v50, 0.0  ;;  %v2175_v53 = vadd.f32 %v2174_v23, %v2132_v49  ;;  %v2183_v37 = vmin.f32 %v2179_v51, 0.9921875 }
 0x2ad   :  { %v2176_v55 = vpop.f32.mrf.mxu1 }
 0x2ae   :  { %v2184_v56 = vmin.f32 %v2180_v44, 0.9921875  ;;  %v2181_v40 = vmax.f32 %v2175_v53, 0.0  ;;  %v2177_v41 = vadd.f32 %v2176_v55, %v2134_v52  ;;  %v2187_v61 = vmul.f32 8.0, %v2183_v37 }
 0x2b0   :  { %v2185_v42 = vmin.f32 %v2181_v40, 0.9921875  ;;  %v2182_v57 = vmax.f32 %v2177_v41, 0.0  ;;  %v2188_v58 = vmul.f32 8.0, %v2184_v56  ;;  %v2191_v2 = vfloor.f32 %v2187_v61 }
 0x2b2   :  { %v2189_v59 = vmul.f32 8.0, %v2185_v42  ;;  %v2186_v60 = vmin.f32 %v2182_v57, 0.9921875  ;;  %v2192_v0 = vfloor.f32 %v2188_v58 }
 0x2b4   :  { %v2190_v62 = vmul.f32 8.0, %v2186_v60  ;;  %v2193_v63 = vfloor.f32 %v2189_v59 }
 0x2b6   :  { %v2194_v1 = vfloor.f32 %v2190_v62  ;;  %v2195_v4 = vpack.c.bf16 %v2193_v63, %v2191_v2 }
 0x2b8   :  { %v2196_v3 = vpack.c.bf16 %v2194_v1, %v2192_v0 }
 0x2ba   :  { %2364 = vmatprep.mubr.bf16.mxu0 %v2196_v3 }
 0x2bb   :  { %2365 = vmatmul.mubr.bf16.vlgmr.msra.gmra.mxu0 %v2195_v4 }
 0x37b   :  { %v2689_v5 = vpop.f32.mrf.mxu0 }
 0x37d   :  { %v2690_v7 = vpop.f32.mrf.mxu0 }
 0x37e   :  { %v2691_v8 = vadd.f32 %v2690_v7, %v2689_v5 }
 0x37f   :  { %v2692_v9 = vpop.f32.mrf.mxu0 }
 0x380   :  { %v2367_v10 = vadd.f32 %v2691_v8, %v2656_v6 }
 0x381   :  { %v2693_v11 = vpop.f32.mrf.mxu0 }
 0x382   :  { %2373 = vst [vmem:[#allocation11] sm:$0xff] %v2367_v10  ;;  %v2694_v14 = vadd.f32 %v2693_v11, %v2692_v9 }
 0x384   :  { %v2370_v15 = vadd.f32 %v2694_v14, %v2656_v6 }
 0x386   :  { %2374 = vst [vmem:[#allocation11 + $0x8] sm:$0xff] %v2370_v15 }
 0x387   :  { %3227 = shalt.err (!%p3224_p1)
}
 0x388   :  { %2386 = dma.vmem_to_hbm [thread:$0]  %s2381_s10, 256, %s3388_s7, [#allocation4], %s3248_s11, %s3248_s11, %s3249_s12  }
 0x389   :  { %3242 = dma.done.wait [#allocation4], 256  }
 0x38a   :  { %3243 = vsyncadd [#allocation4], 4294967040 }
 0x38b   :  { %2390 = vsyncpa [#allocation3], 1 }
 0x38c   :  { %2391 = vsyncpa [#allocation6], 1 }
 0x38d   :  { %2392 = vsyncpa [#allocation9], 1 }
 0x38e   :  { %2393 = vsyncpa [#allocation4], 1 }

</bundles_post_ra>
